<compile_context>
chip_gen: v7x
topology: tpu7x:2x2x1
jax: 0.10.0
libtpu: 0.0.40
codegen_flags: <defaults>
</compile_context>

<pallas_src>
import math

import jax
import jax.numpy as jnp
from jax import lax
from jax.experimental import pallas as pl
from jax.experimental.pallas import tpu as pltpu


# -----------------------------------------------------------------------------
# Pallas kernel
# -----------------------------------------------------------------------------
def _make_decoder_kernel(T, B, E, H, L, S, Vp):
    """Build the fused decoder kernel for static shapes (Vp = padded vocab)."""

    def kernel(*refs):
        # ---- unpack refs -----------------------------------------------------
        embed_x_ref, h0_ref, c0_ref, src_enc_ref, src_len_ref = refs[:5]
        lstm_refs = refs[5:5 + 3 * L]          # per layer: w_ihT, w_hhT, bias
        (w_c2h_ctx_ref, w_c2h_rnn_ref, b_c2h_ref,
         w_h2o_ref, b_h2o_ref) = refs[5 + 3 * L:5 + 3 * L + 5]
        out_ref, hN_ref, cN_ref = refs[5 + 3 * L + 5:]

        # ---- multi-layer LSTM with hoisted input projections -----------------
        # layer_in_flat rows are time-major: row t*B + b.
        layer_in_flat = embed_x_ref[...].reshape(T * B, E)
        last_outs = None

        for l in range(L):
            w_ihT = lstm_refs[3 * l][...]       # (in, 4H), gate cols [i,f,o,g]
            w_hhT = lstm_refs[3 * l + 1][...]   # (H, 4H)
            bias = lstm_refs[3 * l + 2][...]    # (1, 4H)

            # One big input projection per layer (M = T*B rows).
            in_proj = (jnp.dot(layer_in_flat, w_ihT,
                               preferred_element_type=jnp.float32)
                       + bias)                  # (T*B, 4H)

            h = h0_ref[l]                       # (B, H)  kept in registers
            c = c0_ref[l]
            outs = []
            for t in range(T):
                gates = (in_proj[t * B:(t + 1) * B, :]
                         + jnp.dot(h, w_hhT,
                                   preferred_element_type=jnp.float32))  # (B,4H)
                sig = jax.nn.sigmoid(gates[:, :3 * H])      # i, f, o together
                g = jnp.tanh(gates[:, 3 * H:])              # cell candidate
                i_g = sig[:, :H]
                f_g = sig[:, H:2 * H]
                o_g = sig[:, 2 * H:3 * H]
                c = f_g * c + i_g * g
                h = o_g * jnp.tanh(c)
                outs.append(h)

            hN_ref[l] = h                       # single state write per layer
            cN_ref[l] = c
            last_outs = outs
            if l < L - 1:
                layer_in_flat = jnp.concatenate(outs, axis=0)  # (T*B, H)

        # top-layer outputs, batch-first for the attention matmuls
        rnn_bth = jnp.stack(last_outs, axis=1)                 # (B, T, H)

        # ---- Luong dot attention over source encodings ------------------------
        src_bsh = src_enc_ref[...]                             # (B, S, H)
        scores = jnp.einsum('bth,bsh->bts', rnn_bth, src_bsh,
                            preferred_element_type=jnp.float32)  # (B, T, S)
        pos = lax.broadcasted_iota(jnp.int32, (B, S), 1)
        valid = pos < src_len_ref[...]                         # (B, S) bool
        scores = jnp.where(valid[:, None, :], scores, jnp.float32(-1e30))
        m = jnp.max(scores, axis=-1, keepdims=True)
        e = jnp.exp(scores - m)
        denom = jnp.sum(e, axis=-1, keepdims=True)
        alpha = e * pl.reciprocal(denom, approx=True)          # EUP reciprocal
        ctx = jnp.einsum('bts,bsh->bth', alpha, src_bsh,
                         preferred_element_type=jnp.float32)   # (B, T, H)

        # ---- concat + c2h (tanh) + h2o  (dropout == identity, p=0) ------------
        # cat([ctx, rnn], -1) @ Wc.T  ==  ctx @ Wc[:, :H].T + rnn @ Wc[:, H:].T
        ctx2 = ctx.reshape(B * T, H)
        rnn2 = rnn_bth.reshape(B * T, H)
        attn_hidden = jnp.tanh(
            jnp.dot(ctx2, w_c2h_ctx_ref[...], preferred_element_type=jnp.float32)
            + jnp.dot(rnn2, w_c2h_rnn_ref[...], preferred_element_type=jnp.float32)
            + b_c2h_ref[...])                                  # (B*T, H)
        logits = (jnp.dot(attn_hidden, w_h2o_ref[...],
                          preferred_element_type=jnp.float32)
                  + b_h2o_ref[...])                            # (B*T, Vp) lane-dense
        out_ref[...] = logits.reshape(B, T, Vp)

    return kernel


# -----------------------------------------------------------------------------
# Wrapper (parameter plumbing + pallas_call)
# -----------------------------------------------------------------------------
def luong_decoder_forward(params, x_ids, hidden, src_encodings, src_lengths):
    """
    x_ids:          (T, B) int32 token ids
    hidden:         (h0, c0), each (L, B, H)
    src_encodings:  (S, B, H)
    src_lengths:    (B,) int32
    returns:        output (T, B, V), (hN, cN) each (L, B, H)
    """
    T, B = x_ids.shape
    S = src_encodings.shape[0]
    h0, c0 = hidden
    L, _, H = h0.shape
    V, E = params['embedding'].shape
    Vp = ((V + 127) // 128) * 128           # lane-dense padded vocab

    # Glue: embedding gather + layout prep (stays in plain JAX).
    embed_x = params['embedding'][x_ids]                      # (T, B, E)
    src_bsh = jnp.transpose(src_encodings, (1, 0, 2))         # (B, S, H)
    src_len = src_lengths.astype(jnp.int32).reshape(B, 1)

    # Gate-column reorder: PyTorch order [i, f, g, o] -> [i, f, o, g] so the
    # kernel can do a single sigmoid over the first 3H columns.
    def reorder_cols(w):
        return jnp.concatenate([w[..., :2 * H], w[..., 3 * H:], w[..., 2 * H:3 * H]],
                               axis=-1)

    lstm_inputs = []
    for l in range(L):
        w_ihT = reorder_cols(params['lstm_w_ih'][l].T)         # (in, 4H)
        w_hhT = reorder_cols(params['lstm_w_hh'][l].T)         # (H, 4H)
        bias = reorder_cols((params['lstm_b_ih'][l]
                             + params['lstm_b_hh'][l]).reshape(1, 4 * H))
        lstm_inputs += [w_ihT, w_hhT, bias]

    w_c2h_T = params['c2h_w'].T                               # (2H, H)
    w_c2h_ctx = w_c2h_T[:H]                                   # acts on context
    w_c2h_rnn = w_c2h_T[H:]                                   # acts on rnn output
    b_c2h = params['c2h_b'].reshape(1, H)
    w_h2o_T = jnp.zeros((H, Vp), jnp.float32).at[:, :V].set(params['h2o_w'].T)
    b_h2o = jnp.zeros((1, Vp), jnp.float32).at[:, :V].set(params['h2o_b'].reshape(1, V))

    kernel = _make_decoder_kernel(T, B, E, H, L, S, Vp)
    n_in = 5 + 3 * L + 5
    vmem = lambda: pl.BlockSpec(memory_space=pltpu.MemorySpace.VMEM)

    out_btv, hN, cN = pl.pallas_call(
        kernel,
        out_shape=(jax.ShapeDtypeStruct((B, T, Vp), jnp.float32),
                   jax.ShapeDtypeStruct((L, B, H), jnp.float32),
                   jax.ShapeDtypeStruct((L, B, H), jnp.float32)),
        in_specs=[vmem() for _ in range(n_in)],
        out_specs=(vmem(), vmem(), vmem()),
        compiler_params=pltpu.CompilerParams(
            vmem_limit_bytes=32 * 1024 * 1024),
    )(embed_x, h0, c0, src_bsh, src_len, *lstm_inputs,
      w_c2h_ctx, w_c2h_rnn, b_c2h, w_h2o_T, b_h2o)

    out = jnp.transpose(out_btv[:, :, :V], (1, 0, 2))         # (T, B, V)
    return out, (hN, cN)


# -----------------------------------------------------------------------------
# Pure-JAX reference (for a correctness sanity check)
# -----------------------------------------------------------------------------
def reference_forward(params, x_ids, hidden, src_encodings, src_lengths):
    T, B = x_ids.shape
    S = src_encodings.shape[0]
    h0, c0 = hidden
    L, _, H = h0.shape
    embed_x = params['embedding'][x_ids]
    hs = [h0[l] for l in range(L)]
    cs = [c0[l] for l in range(L)]
    outs = []
    for t in range(T):
        x_in = embed_x[t]
        for l in range(L):
            w_ih = params['lstm_w_ih'][l]
            w_hh = params['lstm_w_hh'][l]
            b = params['lstm_b_ih'][l] + params['lstm_b_hh'][l]
            gates = x_in @ w_ih.T + hs[l] @ w_hh.T + b
            i, f, g, o = jnp.split(gates, 4, axis=-1)
            c_new = jax.nn.sigmoid(f) * cs[l] + jax.nn.sigmoid(i) * jnp.tanh(g)
            h_new = jax.nn.sigmoid(o) * jnp.tanh(c_new)
            hs[l], cs[l] = h_new, c_new
            x_in = h_new
        outs.append(x_in)
    rnn_out = jnp.stack(outs)                                  # (T, B, H)
    scores = jnp.einsum('tbh,sbh->tbs', rnn_out, src_encodings)
    mask = jnp.arange(S)[None, :] < src_lengths[:, None]       # (B, S)
    scores = jnp.where(mask[None, :, :], scores, -1e30)
    alpha = jax.nn.softmax(scores, axis=-1)
    context = jnp.einsum('tbs,sbh->tbh', alpha, src_encodings)
    concat = jnp.concatenate([context, rnn_out], axis=-1)
    attn_hidden = jnp.tanh(concat @ params['c2h_w'].T + params['c2h_b'])
    output = attn_hidden @ params['h2o_w'].T + params['h2o_b']
    return output, (jnp.stack(hs), jnp.stack(cs))


# -----------------------------------------------------------------------------
# Deterministic parameter init (shapes as in LuongDecoder.__init__)
# -----------------------------------------------------------------------------
def init_params(key, V, E, H, L):
    n_keys = 1 + 4 * L + 4
    keys = jax.random.split(key, n_keys)
    k = 1.0 / math.sqrt(H)
    params = {'embedding': jax.random.normal(keys[0], (V, E), jnp.float32)}
    w_ih, w_hh, b_ih, b_hh = [], [], [], []
    for l in range(L):
        in_sz = E if l == 0 else H
        kk = keys[1 + 4 * l: 5 + 4 * l]
        w_ih.append(jax.random.uniform(kk[0], (4 * H, in_sz), jnp.float32, -k, k))
        w_hh.append(jax.random.uniform(kk[1], (4 * H, H), jnp.float32, -k, k))
        b_ih.append(jax.random.uniform(kk[2], (4 * H,), jnp.float32, -k, k))
        b_hh.append(jax.random.uniform(kk[3], (4 * H,), jnp.float32, -k, k))
    params['lstm_w_ih'], params['lstm_w_hh'] = w_ih, w_hh
    params['lstm_b_ih'], params['lstm_b_hh'] = b_ih, b_hh
    kc = 1.0 / math.sqrt(2 * H)
    params['c2h_w'] = jax.random.uniform(keys[1 + 4 * L], (H, 2 * H), jnp.float32, -kc, kc)
    params['c2h_b'] = jax.random.uniform(keys[2 + 4 * L], (H,), jnp.float32, -kc, kc)
    params['h2o_w'] = jax.random.uniform(keys[3 + 4 * L], (V, H), jnp.float32, -k, k)
    params['h2o_b'] = jax.random.uniform(keys[4 + 4 * L], (V,), jnp.float32, -k, k)
    return params


if __name__ == "__main__":
    # small shapes: tgt_len=4, batch=2, embed=32, hidden=32, layers=2, src_len=8, vocab=50
    T, B, E, H, L, S, V = 4, 2, 32, 32, 2, 8, 50
    root = jax.random.PRNGKey(0)
    kp, kx, kh, kc, ks = jax.random.split(root, 5)

    params = init_params(kp, V, E, H, L)
    x_ids = jax.random.randint(kx, (T, B), 0, V, dtype=jnp.int32)       # decoder input
    h0 = 0.1 * jax.random.normal(kh, (L, B, H), jnp.float32)
    c0 = 0.1 * jax.random.normal(kc, (L, B, H), jnp.float32)
    src_enc = jax.random.normal(ks, (S, B, H), jnp.float32)
    src_lengths = jnp.array([S, S - 3], dtype=jnp.int32)

    out, (hN, cN) = luong_decoder_forward(params, x_ids, (h0, c0), src_enc, src_lengths)
    out = jax.block_until_ready(out)
    hN = jax.block_until_ready(hN)
    cN = jax.block_until_ready(cN)

    ref_out, (ref_h, ref_c) = reference_forward(params, x_ids, (h0, c0), src_enc, src_lengths)
    assert out.shape == (T, B, V) and hN.shape == (L, B, H) and cN.shape == (L, B, H)
    assert jnp.allclose(out, ref_out, atol=2e-2, rtol=2e-2), "logits mismatch"
    assert jnp.allclose(hN, ref_h, atol=2e-2, rtol=2e-2), "h mismatch"
    assert jnp.allclose(cN, ref_c, atol=2e-2, rtol=2e-2), "c mismatch"

    print("KERNEL_OK")
</pallas_src>

<mosaic_0001>
module attributes {stable_mosaic.version = 11 : i64} {
  func.func @kernel(%arg0: memref<4x2x32xf32, #tpu.memory_space<vmem>>, %arg1: memref<2x2x32xf32, #tpu.memory_space<vmem>>, %arg2: memref<2x2x32xf32, #tpu.memory_space<vmem>>, %arg3: memref<2x8x32xf32, #tpu.memory_space<vmem>>, %arg4: memref<2x1xi32, #tpu.memory_space<vmem>>, %arg5: memref<32x128xf32, #tpu.memory_space<vmem>>, %arg6: memref<32x128xf32, #tpu.memory_space<vmem>>, %arg7: memref<1x128xf32, #tpu.memory_space<vmem>>, %arg8: memref<32x128xf32, #tpu.memory_space<vmem>>, %arg9: memref<32x128xf32, #tpu.memory_space<vmem>>, %arg10: memref<1x128xf32, #tpu.memory_space<vmem>>, %arg11: memref<32x32xf32, #tpu.memory_space<vmem>>, %arg12: memref<32x32xf32, #tpu.memory_space<vmem>>, %arg13: memref<1x32xf32, #tpu.memory_space<vmem>>, %arg14: memref<32x128xf32, #tpu.memory_space<vmem>>, %arg15: memref<1x128xf32, #tpu.memory_space<vmem>>, %arg16: memref<2x4x128xf32, #tpu.memory_space<vmem>>, %arg17: memref<2x2x32xf32, #tpu.memory_space<vmem>>, %arg18: memref<2x2x32xf32, #tpu.memory_space<vmem>>) attributes {dimension_semantics = [], scalar_prefetch = 0 : i64, scratch_operands = 0 : i64, tpu.core_type = #tpu.core_type<tc>} {
    %c0 = arith.constant 0 : index
    %c0_0 = arith.constant 0 : index
    %c0_1 = arith.constant 0 : index
    %0 = vector.load %arg0[%c0, %c0_0, %c0_1] : memref<4x2x32xf32, #tpu.memory_space<vmem>>, vector<4x2x32xf32>
    %1 = vector.shape_cast %0 : vector<4x2x32xf32> to vector<8x32xf32>
    %c0_2 = arith.constant 0 : index
    %c0_3 = arith.constant 0 : index
    %2 = vector.load %arg5[%c0_2, %c0_3] : memref<32x128xf32, #tpu.memory_space<vmem>>, vector<32x128xf32>
    %c0_4 = arith.constant 0 : index
    %c0_5 = arith.constant 0 : index
    %3 = vector.load %arg6[%c0_4, %c0_5] : memref<32x128xf32, #tpu.memory_space<vmem>>, vector<32x128xf32>
    %c0_6 = arith.constant 0 : index
    %c0_7 = arith.constant 0 : index
    %4 = vector.load %arg7[%c0_6, %c0_7] : memref<1x128xf32, #tpu.memory_space<vmem>>, vector<1x128xf32>
    %cst = arith.constant dense<0.000000e+00> : vector<8x128xf32>
    %5 = tpu.matmul %1, %2, %cst {dimension_numbers = #tpu.dot_dimension_numbers<[1], [0], [0], [1], [0, 0, 1, 1], [], []>} : vector<8x32xf32>, vector<32x128xf32>, vector<8x128xf32> -> vector<8x128xf32>
    %6 = vector.broadcast %4 : vector<1x128xf32> to vector<8x128xf32>
    %7 = arith.addf %5, %6 : vector<8x128xf32>
    %c0_8 = arith.constant 0 : index
    %c0_9 = arith.constant 0 : index
    %c0_10 = arith.constant 0 : index
    %8 = vector.load %arg1[%c0_8, %c0_9, %c0_10] : memref<2x2x32xf32, #tpu.memory_space<vmem>>, vector<1x2x32xf32>
    %9 = vector.shape_cast %8 : vector<1x2x32xf32> to vector<2x32xf32>
    %c0_11 = arith.constant 0 : index
    %c0_12 = arith.constant 0 : index
    %c0_13 = arith.constant 0 : index
    %10 = vector.load %arg2[%c0_11, %c0_12, %c0_13] : memref<2x2x32xf32, #tpu.memory_space<vmem>>, vector<1x2x32xf32>
    %11 = vector.shape_cast %10 : vector<1x2x32xf32> to vector<2x32xf32>
    %12 = vector.extract_strided_slice %7 {offsets = [0, 0], sizes = [2, 128], strides = [1, 1]} : vector<8x128xf32> to vector<2x128xf32>
    %cst_14 = arith.constant dense<0.000000e+00> : vector<2x128xf32>
    %13 = tpu.matmul %9, %3, %cst_14 {dimension_numbers = #tpu.dot_dimension_numbers<[1], [0], [0], [1], [0, 0, 1, 1], [], []>} : vector<2x32xf32>, vector<32x128xf32>, vector<2x128xf32> -> vector<2x128xf32>
    %14 = arith.addf %12, %13 : vector<2x128xf32>
    %15 = vector.extract_strided_slice %14 {offsets = [0, 0], sizes = [2, 96], strides = [1, 1]} : vector<2x128xf32> to vector<2x96xf32>
    %16 = arith.negf %15 : vector<2x96xf32>
    %17 = math.exp %16 : vector<2x96xf32>
    %cst_15 = arith.constant 1.000000e+00 : f32
    %18 = vector.broadcast %cst_15 : f32 to vector<2x96xf32>
    %19 = arith.addf %18, %17 : vector<2x96xf32>
    %20 = arith.divf %18, %19 : vector<2x96xf32>
    %21 = vector.extract_strided_slice %14 {offsets = [0, 96], sizes = [2, 32], strides = [1, 1]} : vector<2x128xf32> to vector<2x32xf32>
    %22 = math.tanh %21 : vector<2x32xf32>
    %23 = vector.extract_strided_slice %20 {offsets = [0, 0], sizes = [2, 32], strides = [1, 1]} : vector<2x96xf32> to vector<2x32xf32>
    %24 = vector.extract_strided_slice %20 {offsets = [0, 32], sizes = [2, 32], strides = [1, 1]} : vector<2x96xf32> to vector<2x32xf32>
    %25 = vector.extract_strided_slice %20 {offsets = [0, 64], sizes = [2, 32], strides = [1, 1]} : vector<2x96xf32> to vector<2x32xf32>
    %26 = arith.mulf %24, %11 : vector<2x32xf32>
    %27 = arith.mulf %23, %22 : vector<2x32xf32>
    %28 = arith.addf %26, %27 : vector<2x32xf32>
    %29 = math.tanh %28 : vector<2x32xf32>
    %30 = arith.mulf %25, %29 : vector<2x32xf32>
    %31 = vector.extract_strided_slice %7 {offsets = [2, 0], sizes = [2, 128], strides = [1, 1]} : vector<8x128xf32> to vector<2x128xf32>
    %cst_16 = arith.constant dense<0.000000e+00> : vector<2x128xf32>
    %32 = tpu.matmul %30, %3, %cst_16 {dimension_numbers = #tpu.dot_dimension_numbers<[1], [0], [0], [1], [0, 0, 1, 1], [], []>} : vector<2x32xf32>, vector<32x128xf32>, vector<2x128xf32> -> vector<2x128xf32>
    %33 = arith.addf %31, %32 : vector<2x128xf32>
    %34 = vector.extract_strided_slice %33 {offsets = [0, 0], sizes = [2, 96], strides = [1, 1]} : vector<2x128xf32> to vector<2x96xf32>
    %35 = arith.negf %34 : vector<2x96xf32>
    %36 = math.exp %35 : vector<2x96xf32>
    %cst_17 = arith.constant 1.000000e+00 : f32
    %37 = vector.broadcast %cst_17 : f32 to vector<2x96xf32>
    %38 = arith.addf %37, %36 : vector<2x96xf32>
    %39 = arith.divf %37, %38 : vector<2x96xf32>
    %40 = vector.extract_strided_slice %33 {offsets = [0, 96], sizes = [2, 32], strides = [1, 1]} : vector<2x128xf32> to vector<2x32xf32>
    %41 = math.tanh %40 : vector<2x32xf32>
    %42 = vector.extract_strided_slice %39 {offsets = [0, 0], sizes = [2, 32], strides = [1, 1]} : vector<2x96xf32> to vector<2x32xf32>
    %43 = vector.extract_strided_slice %39 {offsets = [0, 32], sizes = [2, 32], strides = [1, 1]} : vector<2x96xf32> to vector<2x32xf32>
    %44 = vector.extract_strided_slice %39 {offsets = [0, 64], sizes = [2, 32], strides = [1, 1]} : vector<2x96xf32> to vector<2x32xf32>
    %45 = arith.mulf %43, %28 : vector<2x32xf32>
    %46 = arith.mulf %42, %41 : vector<2x32xf32>
    %47 = arith.addf %45, %46 : vector<2x32xf32>
    %48 = math.tanh %47 : vector<2x32xf32>
    %49 = arith.mulf %44, %48 : vector<2x32xf32>
    %50 = vector.extract_strided_slice %7 {offsets = [4, 0], sizes = [2, 128], strides = [1, 1]} : vector<8x128xf32> to vector<2x128xf32>
    %cst_18 = arith.constant dense<0.000000e+00> : vector<2x128xf32>
    %51 = tpu.matmul %49, %3, %cst_18 {dimension_numbers = #tpu.dot_dimension_numbers<[1], [0], [0], [1], [0, 0, 1, 1], [], []>} : vector<2x32xf32>, vector<32x128xf32>, vector<2x128xf32> -> vector<2x128xf32>
    %52 = arith.addf %50, %51 : vector<2x128xf32>
    %53 = vector.extract_strided_slice %52 {offsets = [0, 0], sizes = [2, 96], strides = [1, 1]} : vector<2x128xf32> to vector<2x96xf32>
    %54 = arith.negf %53 : vector<2x96xf32>
    %55 = math.exp %54 : vector<2x96xf32>
    %cst_19 = arith.constant 1.000000e+00 : f32
    %56 = vector.broadcast %cst_19 : f32 to vector<2x96xf32>
    %57 = arith.addf %56, %55 : vector<2x96xf32>
    %58 = arith.divf %56, %57 : vector<2x96xf32>
    %59 = vector.extract_strided_slice %52 {offsets = [0, 96], sizes = [2, 32], strides = [1, 1]} : vector<2x128xf32> to vector<2x32xf32>
    %60 = math.tanh %59 : vector<2x32xf32>
    %61 = vector.extract_strided_slice %58 {offsets = [0, 0], sizes = [2, 32], strides = [1, 1]} : vector<2x96xf32> to vector<2x32xf32>
    %62 = vector.extract_strided_slice %58 {offsets = [0, 32], sizes = [2, 32], strides = [1, 1]} : vector<2x96xf32> to vector<2x32xf32>
    %63 = vector.extract_strided_slice %58 {offsets = [0, 64], sizes = [2, 32], strides = [1, 1]} : vector<2x96xf32> to vector<2x32xf32>
    %64 = arith.mulf %62, %47 : vector<2x32xf32>
    %65 = arith.mulf %61, %60 : vector<2x32xf32>
    %66 = arith.addf %64, %65 : vector<2x32xf32>
    %67 = math.tanh %66 : vector<2x32xf32>
    %68 = arith.mulf %63, %67 : vector<2x32xf32>
    %69 = vector.extract_strided_slice %7 {offsets = [6, 0], sizes = [2, 128], strides = [1, 1]} : vector<8x128xf32> to vector<2x128xf32>
    %cst_20 = arith.constant dense<0.000000e+00> : vector<2x128xf32>
    %70 = tpu.matmul %68, %3, %cst_20 {dimension_numbers = #tpu.dot_dimension_numbers<[1], [0], [0], [1], [0, 0, 1, 1], [], []>} : vector<2x32xf32>, vector<32x128xf32>, vector<2x128xf32> -> vector<2x128xf32>
    %71 = arith.addf %69, %70 : vector<2x128xf32>
    %72 = vector.extract_strided_slice %71 {offsets = [0, 0], sizes = [2, 96], strides = [1, 1]} : vector<2x128xf32> to vector<2x96xf32>
    %73 = arith.negf %72 : vector<2x96xf32>
    %74 = math.exp %73 : vector<2x96xf32>
    %cst_21 = arith.constant 1.000000e+00 : f32
    %75 = vector.broadcast %cst_21 : f32 to vector<2x96xf32>
    %76 = arith.addf %75, %74 : vector<2x96xf32>
    %77 = arith.divf %75, %76 : vector<2x96xf32>
    %78 = vector.extract_strided_slice %71 {offsets = [0, 96], sizes = [2, 32], strides = [1, 1]} : vector<2x128xf32> to vector<2x32xf32>
    %79 = math.tanh %78 : vector<2x32xf32>
    %80 = vector.extract_strided_slice %77 {offsets = [0, 0], sizes = [2, 32], strides = [1, 1]} : vector<2x96xf32> to vector<2x32xf32>
    %81 = vector.extract_strided_slice %77 {offsets = [0, 32], sizes = [2, 32], strides = [1, 1]} : vector<2x96xf32> to vector<2x32xf32>
    %82 = vector.extract_strided_slice %77 {offsets = [0, 64], sizes = [2, 32], strides = [1, 1]} : vector<2x96xf32> to vector<2x32xf32>
    %83 = arith.mulf %81, %66 : vector<2x32xf32>
    %84 = arith.mulf %80, %79 : vector<2x32xf32>
    %85 = arith.addf %83, %84 : vector<2x32xf32>
    %86 = math.tanh %85 : vector<2x32xf32>
    %87 = arith.mulf %82, %86 : vector<2x32xf32>
    %c0_22 = arith.constant 0 : index
    %c0_23 = arith.constant 0 : index
    %c0_24 = arith.constant 0 : index
    %88 = vector.load %arg17[%c0_22, %c0_23, %c0_24] : memref<2x2x32xf32, #tpu.memory_space<vmem>>, vector<1x2x32xf32>
    %89 = vector.shape_cast %88 : vector<1x2x32xf32> to vector<2x32xf32>
    %90 = vector.shape_cast %87 : vector<2x32xf32> to vector<1x2x32xf32>
    tpu.vector_store %arg17[%c0_22, %c0_23, %c0_24], %90 {strides = array<i32>} : memref<2x2x32xf32, #tpu.memory_space<vmem>>, vector<1x2x32xf32>,
    %c0_25 = arith.constant 0 : index
    %c0_26 = arith.constant 0 : index
    %c0_27 = arith.constant 0 : index
    %91 = vector.load %arg18[%c0_25, %c0_26, %c0_27] : memref<2x2x32xf32, #tpu.memory_space<vmem>>, vector<1x2x32xf32>
    %92 = vector.shape_cast %91 : vector<1x2x32xf32> to vector<2x32xf32>
    %93 = vector.shape_cast %85 : vector<2x32xf32> to vector<1x2x32xf32>
    tpu.vector_store %arg18[%c0_25, %c0_26, %c0_27], %93 {strides = array<i32>} : memref<2x2x32xf32, #tpu.memory_space<vmem>>, vector<1x2x32xf32>,
    %94 = tpu.concatenate %30, %49, %68, %87 in 0 : vector<2x32xf32>, vector<2x32xf32>, vector<2x32xf32>, vector<2x32xf32> -> vector<8x32xf32>
    %c0_28 = arith.constant 0 : index
    %c0_29 = arith.constant 0 : index
    %95 = vector.load %arg8[%c0_28, %c0_29] : memref<32x128xf32, #tpu.memory_space<vmem>>, vector<32x128xf32>
    %c0_30 = arith.constant 0 : index
    %c0_31 = arith.constant 0 : index
    %96 = vector.load %arg9[%c0_30, %c0_31] : memref<32x128xf32, #tpu.memory_space<vmem>>, vector<32x128xf32>
    %c0_32 = arith.constant 0 : index
    %c0_33 = arith.constant 0 : index
    %97 = vector.load %arg10[%c0_32, %c0_33] : memref<1x128xf32, #tpu.memory_space<vmem>>, vector<1x128xf32>
    %cst_34 = arith.constant dense<0.000000e+00> : vector<8x128xf32>
    %98 = tpu.matmul %94, %95, %cst_34 {dimension_numbers = #tpu.dot_dimension_numbers<[1], [0], [0], [1], [0, 0, 1, 1], [], []>} : vector<8x32xf32>, vector<32x128xf32>, vector<8x128xf32> -> vector<8x128xf32>
    %99 = vector.broadcast %97 : vector<1x128xf32> to vector<8x128xf32>
    %100 = arith.addf %98, %99 : vector<8x128xf32>
    %c1 = arith.constant 1 : index
    %c0_35 = arith.constant 0 : index
    %c0_36 = arith.constant 0 : index
    %101 = vector.load %arg1[%c1, %c0_35, %c0_36] : memref<2x2x32xf32, #tpu.memory_space<vmem>>, vector<1x2x32xf32>
    %102 = vector.shape_cast %101 : vector<1x2x32xf32> to vector<2x32xf32>
    %c1_37 = arith.constant 1 : index
    %c0_38 = arith.constant 0 : index
    %c0_39 = arith.constant 0 : index
    %103 = vector.load %arg2[%c1_37, %c0_38, %c0_39] : memref<2x2x32xf32, #tpu.memory_space<vmem>>, vector<1x2x32xf32>
    %104 = vector.shape_cast %103 : vector<1x2x32xf32> to vector<2x32xf32>
    %105 = vector.extract_strided_slice %100 {offsets = [0, 0], sizes = [2, 128], strides = [1, 1]} : vector<8x128xf32> to vector<2x128xf32>
    %cst_40 = arith.constant dense<0.000000e+00> : vector<2x128xf32>
    %106 = tpu.matmul %102, %96, %cst_40 {dimension_numbers = #tpu.dot_dimension_numbers<[1], [0], [0], [1], [0, 0, 1, 1], [], []>} : vector<2x32xf32>, vector<32x128xf32>, vector<2x128xf32> -> vector<2x128xf32>
    %107 = arith.addf %105, %106 : vector<2x128xf32>
    %108 = vector.extract_strided_slice %107 {offsets = [0, 0], sizes = [2, 96], strides = [1, 1]} : vector<2x128xf32> to vector<2x96xf32>
    %109 = arith.negf %108 : vector<2x96xf32>
    %110 = math.exp %109 : vector<2x96xf32>
    %cst_41 = arith.constant 1.000000e+00 : f32
    %111 = vector.broadcast %cst_41 : f32 to vector<2x96xf32>
    %112 = arith.addf %111, %110 : vector<2x96xf32>
    %113 = arith.divf %111, %112 : vector<2x96xf32>
    %114 = vector.extract_strided_slice %107 {offsets = [0, 96], sizes = [2, 32], strides = [1, 1]} : vector<2x128xf32> to vector<2x32xf32>
    %115 = math.tanh %114 : vector<2x32xf32>
    %116 = vector.extract_strided_slice %113 {offsets = [0, 0], sizes = [2, 32], strides = [1, 1]} : vector<2x96xf32> to vector<2x32xf32>
    %117 = vector.extract_strided_slice %113 {offsets = [0, 32], sizes = [2, 32], strides = [1, 1]} : vector<2x96xf32> to vector<2x32xf32>
    %118 = vector.extract_strided_slice %113 {offsets = [0, 64], sizes = [2, 32], strides = [1, 1]} : vector<2x96xf32> to vector<2x32xf32>
    %119 = arith.mulf %117, %104 : vector<2x32xf32>
    %120 = arith.mulf %116, %115 : vector<2x32xf32>
    %121 = arith.addf %119, %120 : vector<2x32xf32>
    %122 = math.tanh %121 : vector<2x32xf32>
    %123 = arith.mulf %118, %122 : vector<2x32xf32>
    %124 = vector.extract_strided_slice %100 {offsets = [2, 0], sizes = [2, 128], strides = [1, 1]} : vector<8x128xf32> to vector<2x128xf32>
    %cst_42 = arith.constant dense<0.000000e+00> : vector<2x128xf32>
    %125 = tpu.matmul %123, %96, %cst_42 {dimension_numbers = #tpu.dot_dimension_numbers<[1], [0], [0], [1], [0, 0, 1, 1], [], []>} : vector<2x32xf32>, vector<32x128xf32>, vector<2x128xf32> -> vector<2x128xf32>
    %126 = arith.addf %124, %125 : vector<2x128xf32>
    %127 = vector.extract_strided_slice %126 {offsets = [0, 0], sizes = [2, 96], strides = [1, 1]} : vector<2x128xf32> to vector<2x96xf32>
    %128 = arith.negf %127 : vector<2x96xf32>
    %129 = math.exp %128 : vector<2x96xf32>
    %cst_43 = arith.constant 1.000000e+00 : f32
    %130 = vector.broadcast %cst_43 : f32 to vector<2x96xf32>
    %131 = arith.addf %130, %129 : vector<2x96xf32>
    %132 = arith.divf %130, %131 : vector<2x96xf32>
    %133 = vector.extract_strided_slice %126 {offsets = [0, 96], sizes = [2, 32], strides = [1, 1]} : vector<2x128xf32> to vector<2x32xf32>
    %134 = math.tanh %133 : vector<2x32xf32>
    %135 = vector.extract_strided_slice %132 {offsets = [0, 0], sizes = [2, 32], strides = [1, 1]} : vector<2x96xf32> to vector<2x32xf32>
    %136 = vector.extract_strided_slice %132 {offsets = [0, 32], sizes = [2, 32], strides = [1, 1]} : vector<2x96xf32> to vector<2x32xf32>
    %137 = vector.extract_strided_slice %132 {offsets = [0, 64], sizes = [2, 32], strides = [1, 1]} : vector<2x96xf32> to vector<2x32xf32>
    %138 = arith.mulf %136, %121 : vector<2x32xf32>
    %139 = arith.mulf %135, %134 : vector<2x32xf32>
    %140 = arith.addf %138, %139 : vector<2x32xf32>
    %141 = math.tanh %140 : vector<2x32xf32>
    %142 = arith.mulf %137, %141 : vector<2x32xf32>
    %143 = vector.extract_strided_slice %100 {offsets = [4, 0], sizes = [2, 128], strides = [1, 1]} : vector<8x128xf32> to vector<2x128xf32>
    %cst_44 = arith.constant dense<0.000000e+00> : vector<2x128xf32>
    %144 = tpu.matmul %142, %96, %cst_44 {dimension_numbers = #tpu.dot_dimension_numbers<[1], [0], [0], [1], [0, 0, 1, 1], [], []>} : vector<2x32xf32>, vector<32x128xf32>, vector<2x128xf32> -> vector<2x128xf32>
    %145 = arith.addf %143, %144 : vector<2x128xf32>
    %146 = vector.extract_strided_slice %145 {offsets = [0, 0], sizes = [2, 96], strides = [1, 1]} : vector<2x128xf32> to vector<2x96xf32>
    %147 = arith.negf %146 : vector<2x96xf32>
    %148 = math.exp %147 : vector<2x96xf32>
    %cst_45 = arith.constant 1.000000e+00 : f32
    %149 = vector.broadcast %cst_45 : f32 to vector<2x96xf32>
    %150 = arith.addf %149, %148 : vector<2x96xf32>
    %151 = arith.divf %149, %150 : vector<2x96xf32>
    %152 = vector.extract_strided_slice %145 {offsets = [0, 96], sizes = [2, 32], strides = [1, 1]} : vector<2x128xf32> to vector<2x32xf32>
    %153 = math.tanh %152 : vector<2x32xf32>
    %154 = vector.extract_strided_slice %151 {offsets = [0, 0], sizes = [2, 32], strides = [1, 1]} : vector<2x96xf32> to vector<2x32xf32>
    %155 = vector.extract_strided_slice %151 {offsets = [0, 32], sizes = [2, 32], strides = [1, 1]} : vector<2x96xf32> to vector<2x32xf32>
    %156 = vector.extract_strided_slice %151 {offsets = [0, 64], sizes = [2, 32], strides = [1, 1]} : vector<2x96xf32> to vector<2x32xf32>
    %157 = arith.mulf %155, %140 : vector<2x32xf32>
    %158 = arith.mulf %154, %153 : vector<2x32xf32>
    %159 = arith.addf %157, %158 : vector<2x32xf32>
    %160 = math.tanh %159 : vector<2x32xf32>
    %161 = arith.mulf %156, %160 : vector<2x32xf32>
    %162 = vector.extract_strided_slice %100 {offsets = [6, 0], sizes = [2, 128], strides = [1, 1]} : vector<8x128xf32> to vector<2x128xf32>
    %cst_46 = arith.constant dense<0.000000e+00> : vector<2x128xf32>
    %163 = tpu.matmul %161, %96, %cst_46 {dimension_numbers = #tpu.dot_dimension_numbers<[1], [0], [0], [1], [0, 0, 1, 1], [], []>} : vector<2x32xf32>, vector<32x128xf32>, vector<2x128xf32> -> vector<2x128xf32>
    %164 = arith.addf %162, %163 : vector<2x128xf32>
    %165 = vector.extract_strided_slice %164 {offsets = [0, 0], sizes = [2, 96], strides = [1, 1]} : vector<2x128xf32> to vector<2x96xf32>
    %166 = arith.negf %165 : vector<2x96xf32>
    %167 = math.exp %166 : vector<2x96xf32>
    %cst_47 = arith.constant 1.000000e+00 : f32
    %168 = vector.broadcast %cst_47 : f32 to vector<2x96xf32>
    %169 = arith.addf %168, %167 : vector<2x96xf32>
    %170 = arith.divf %168, %169 : vector<2x96xf32>
    %171 = vector.extract_strided_slice %164 {offsets = [0, 96], sizes = [2, 32], strides = [1, 1]} : vector<2x128xf32> to vector<2x32xf32>
    %172 = math.tanh %171 : vector<2x32xf32>
    %173 = vector.extract_strided_slice %170 {offsets = [0, 0], sizes = [2, 32], strides = [1, 1]} : vector<2x96xf32> to vector<2x32xf32>
    %174 = vector.extract_strided_slice %170 {offsets = [0, 32], sizes = [2, 32], strides = [1, 1]} : vector<2x96xf32> to vector<2x32xf32>
    %175 = vector.extract_strided_slice %170 {offsets = [0, 64], sizes = [2, 32], strides = [1, 1]} : vector<2x96xf32> to vector<2x32xf32>
    %176 = arith.mulf %174, %159 : vector<2x32xf32>
    %177 = arith.mulf %173, %172 : vector<2x32xf32>
    %178 = arith.addf %176, %177 : vector<2x32xf32>
    %179 = math.tanh %178 : vector<2x32xf32>
    %180 = arith.mulf %175, %179 : vector<2x32xf32>
    %c1_48 = arith.constant 1 : index
    %c0_49 = arith.constant 0 : index
    %c0_50 = arith.constant 0 : index
    %181 = vector.load %arg17[%c1_48, %c0_49, %c0_50] : memref<2x2x32xf32, #tpu.memory_space<vmem>>, vector<1x2x32xf32>
    %182 = vector.shape_cast %181 : vector<1x2x32xf32> to vector<2x32xf32>
    %183 = vector.shape_cast %180 : vector<2x32xf32> to vector<1x2x32xf32>
    tpu.vector_store %arg17[%c1_48, %c0_49, %c0_50], %183 {strides = array<i32>} : memref<2x2x32xf32, #tpu.memory_space<vmem>>, vector<1x2x32xf32>,
    %c1_51 = arith.constant 1 : index
    %c0_52 = arith.constant 0 : index
    %c0_53 = arith.constant 0 : index
    %184 = vector.load %arg18[%c1_51, %c0_52, %c0_53] : memref<2x2x32xf32, #tpu.memory_space<vmem>>, vector<1x2x32xf32>
    %185 = vector.shape_cast %184 : vector<1x2x32xf32> to vector<2x32xf32>
    %186 = vector.shape_cast %178 : vector<2x32xf32> to vector<1x2x32xf32>
    tpu.vector_store %arg18[%c1_51, %c0_52, %c0_53], %186 {strides = array<i32>} : memref<2x2x32xf32, #tpu.memory_space<vmem>>, vector<1x2x32xf32>,
    %187 = vector.shape_cast %123 : vector<2x32xf32> to vector<2x1x32xf32>
    %188 = vector.shape_cast %142 : vector<2x32xf32> to vector<2x1x32xf32>
    %189 = vector.shape_cast %161 : vector<2x32xf32> to vector<2x1x32xf32>
    %190 = vector.shape_cast %180 : vector<2x32xf32> to vector<2x1x32xf32>
    %191 = tpu.concatenate %187, %188, %189, %190 in 1 : vector<2x1x32xf32>, vector<2x1x32xf32>, vector<2x1x32xf32>, vector<2x1x32xf32> -> vector<2x4x32xf32>
    %c0_54 = arith.constant 0 : index
    %c0_55 = arith.constant 0 : index
    %c0_56 = arith.constant 0 : index
    %192 = vector.load %arg3[%c0_54, %c0_55, %c0_56] : memref<2x8x32xf32, #tpu.memory_space<vmem>>, vector<2x8x32xf32>
    "tpu.trace_start"() <{level = 10 : i32, message = "bth,bsh->bts"}> : () -> ()
    %cst_57 = arith.constant dense<0.000000e+00> : vector<2x4x8xf32>
    %193 = tpu.matmul %191, %192, %cst_57 {dimension_numbers = #tpu.dot_dimension_numbers<[2], [2], [1], [1], [0, 0, 0, 1, 1, 1], [0], [0]>} : vector<2x4x32xf32>, vector<2x8x32xf32>, vector<2x4x8xf32> -> vector<2x4x8xf32>
    "tpu.trace_stop"() : () -> ()
    %194 = tpu.iota {dimensions = array<i32: 1>} : vector<2x8xi32>
    %c0_58 = arith.constant 0 : index
    %c0_59 = arith.constant 0 : index
    %195 = vector.load %arg4[%c0_58, %c0_59] : memref<2x1xi32, #tpu.memory_space<vmem>>, vector<2x1xi32>
    %196 = vector.broadcast %195 : vector<2x1xi32> to vector<2x8xi32>
    %197 = arith.cmpi slt, %194, %196 : vector<2x8xi32>
    %198 = vector.shape_cast %197 : vector<2x8xi1> to vector<2x1x8xi1>
    %cst_60 = arith.constant -1.000000e+30 : f32
    %199 = vector.shape_cast %198 : vector<2x1x8xi1> to vector<2x1x8xi1>
    %200 = vector.broadcast %199 : vector<2x1x8xi1> to vector<2x4x8xi1>
    %201 = vector.broadcast %cst_60 : f32 to vector<2x4x8xf32>
    %202 = arith.select %200, %193, %201 : vector<2x4x8xi1>, vector<2x4x8xf32>
    %cst_61 = arith.constant dense<0xFF800000> : vector<2x4xf32>
    %203 = vector.multi_reduction <maximumf>, %202, %cst_61 [2] : vector<2x4x8xf32> to vector<2x4xf32>
    %204 = vector.shape_cast %203 : vector<2x4xf32> to vector<2x4x1xf32>
    %205 = vector.broadcast %204 : vector<2x4x1xf32> to vector<2x4x8xf32>
    %206 = arith.subf %202, %205 : vector<2x4x8xf32>
    %207 = math.exp %206 : vector<2x4x8xf32>
    %cst_62 = arith.constant dense<0.000000e+00> : vector<2x4xf32>
    %208 = vector.multi_reduction <add>, %207, %cst_62 [2] : vector<2x4x8xf32> to vector<2x4xf32>
    %209 = vector.shape_cast %208 : vector<2x4xf32> to vector<2x4x1xf32>
    %210 = tpu.reciprocal %209 {approx = true} : vector<2x4x1xf32> -> vector<2x4x1xf32>
    %211 = vector.broadcast %210 : vector<2x4x1xf32> to vector<2x4x8xf32>
    %212 = arith.mulf %207, %211 : vector<2x4x8xf32>
    "tpu.trace_start"() <{level = 10 : i32, message = "bts,bsh->bth"}> : () -> ()
    %cst_63 = arith.constant dense<0.000000e+00> : vector<2x4x32xf32>
    %213 = tpu.matmul %212, %192, %cst_63 {dimension_numbers = #tpu.dot_dimension_numbers<[2], [1], [1], [2], [0, 0, 0, 1, 1, 2], [0], [0]>} : vector<2x4x8xf32>, vector<2x8x32xf32>, vector<2x4x32xf32> -> vector<2x4x32xf32>
    "tpu.trace_stop"() : () -> ()
    %214 = vector.shape_cast %213 : vector<2x4x32xf32> to vector<8x32xf32>
    %215 = vector.shape_cast %191 : vector<2x4x32xf32> to vector<8x32xf32>
    %c0_64 = arith.constant 0 : index
    %c0_65 = arith.constant 0 : index
    %216 = vector.load %arg11[%c0_64, %c0_65] : memref<32x32xf32, #tpu.memory_space<vmem>>, vector<32x32xf32>
    %cst_66 = arith.constant dense<0.000000e+00> : vector<8x32xf32>
    %217 = tpu.matmul %214, %216, %cst_66 {dimension_numbers = #tpu.dot_dimension_numbers<[1], [0], [0], [1], [0, 0, 1, 1], [], []>} : vector<8x32xf32>, vector<32x32xf32>, vector<8x32xf32> -> vector<8x32xf32>
    %c0_67 = arith.constant 0 : index
    %c0_68 = arith.constant 0 : index
    %218 = vector.load %arg12[%c0_67, %c0_68] : memref<32x32xf32, #tpu.memory_space<vmem>>, vector<32x32xf32>
    %cst_69 = arith.constant dense<0.000000e+00> : vector<8x32xf32>
    %219 = tpu.matmul %215, %218, %cst_69 {dimension_numbers = #tpu.dot_dimension_numbers<[1], [0], [0], [1], [0, 0, 1, 1], [], []>} : vector<8x32xf32>, vector<32x32xf32>, vector<8x32xf32> -> vector<8x32xf32>
    %220 = arith.addf %217, %219 : vector<8x32xf32>
    %c0_70 = arith.constant 0 : index
    %c0_71 = arith.constant 0 : index
    %221 = vector.load %arg13[%c0_70, %c0_71] : memref<1x32xf32, #tpu.memory_space<vmem>>, vector<1x32xf32>
    %222 = vector.broadcast %221 : vector<1x32xf32> to vector<8x32xf32>
    %223 = arith.addf %220, %222 : vector<8x32xf32>
    %224 = math.tanh %223 : vector<8x32xf32>
    %c0_72 = arith.constant 0 : index
    %c0_73 = arith.constant 0 : index
    %225 = vector.load %arg14[%c0_72, %c0_73] : memref<32x128xf32, #tpu.memory_space<vmem>>, vector<32x128xf32>
    %cst_74 = arith.constant dense<0.000000e+00> : vector<8x128xf32>
    %226 = tpu.matmul %224, %225, %cst_74 {dimension_numbers = #tpu.dot_dimension_numbers<[1], [0], [0], [1], [0, 0, 1, 1], [], []>} : vector<8x32xf32>, vector<32x128xf32>, vector<8x128xf32> -> vector<8x128xf32>
    %c0_75 = arith.constant 0 : index
    %c0_76 = arith.constant 0 : index
    %227 = vector.load %arg15[%c0_75, %c0_76] : memref<1x128xf32, #tpu.memory_space<vmem>>, vector<1x128xf32>
    %228 = vector.broadcast %227 : vector<1x128xf32> to vector<8x128xf32>
    %229 = arith.addf %226, %228 : vector<8x128xf32>
    %230 = vector.shape_cast %229 : vector<8x128xf32> to vector<2x4x128xf32>
    %c0_77 = arith.constant 0 : index
    %c0_78 = arith.constant 0 : index
    %c0_79 = arith.constant 0 : index
    %231 = vector.load %arg16[%c0_77, %c0_78, %c0_79] : memref<2x4x128xf32, #tpu.memory_space<vmem>>, vector<2x4x128xf32>
    tpu.vector_store %arg16[%c0_77, %c0_78, %c0_79], %230 {strides = array<i32>} : memref<2x4x128xf32, #tpu.memory_space<vmem>>, vector<2x4x128xf32>,
    return
  }
}

</mosaic_0001>

<bundles_post_ra>
// kernel: tpu_custom_call.1
= control target key start
LH: loop header
LB: loop body
LE: loop exit
PB: predicated region body
PF: predicated region fallthrough
CT: control target
= control target key end

     0   :  { %s3423_s0 = inlined_call_operand.hbm [shape: f32[4,2,32], index: 0, kind: input, shape index: {}]   ;;  %s3424_s1 = inlined_call_operand.hbm [shape: f32[2,2,32], index: 1, kind: input, shape index: {}]   ;;  %s3425_s2 = inlined_call_operand.hbm [shape: f32[2,2,32], index: 2, kind: input, shape index: {}]   ;;  %s3426_s3 = inlined_call_operand.hbm [shape: f32[2,8,32], index: 3, kind: input, shape index: {}]   ;;  %s3427_s4 = inlined_call_operand.vmem [shape: s32[2,1], index: 4, kind: input, shape index: {}]   ;;  %s3428_s5 = inlined_call_operand.hbm [shape: f32[32,128], index: 5, kind: input, shape index: {}]   ;;  %s3429_s6 = inlined_call_operand.hbm [shape: f32[32,128], index: 6, kind: input, shape index: {}]   ;;  %s3430_s7 = inlined_call_operand.vmem [shape: f32[1,128], index: 7, kind: input, shape index: {}]   ;;  %s3431_s8 = inlined_call_operand.vmem [shape: f32[32,128], index: 8, kind: input, shape index: {}]   ;;  %s3432_s9 = inlined_call_operand.hbm [shape: f32[32,128], index: 9, kind: input, shape index: {}]   ;;  %s3433_s10 = inlined_call_operand.vmem [shape: f32[1,128], index: 10, kind: input, shape index: {}]   ;;  %s3434_s11 = inlined_call_operand.hbm [shape: f32[32,32], index: 11, kind: input, shape index: {}]   ;;  %s3435_s12 = inlined_call_operand.hbm [shape: f32[32,32], index: 12, kind: input, shape index: {}]   ;;  %s3436_s13 = inlined_call_operand.vmem [shape: f32[1,32], index: 13, kind: input, shape index: {}]   ;;  %s3437_s14 = inlined_call_operand.hbm [shape: f32[32,128], index: 14, kind: input, shape index: {}]   ;;  %s3438_s15 = inlined_call_operand.vmem [shape: f32[1,128], index: 15, kind: input, shape index: {}]   ;;  %s3439_s16 = inlined_call_operand.hbm [shape: f32[2,4,128], index: 16, kind: output, shape index: {0}]   ;;  %s3440_s17 = inlined_call_operand.hbm [shape: f32[2,2,32], index: 17, kind: output, shape index: {1}]   ;;  %s3441_s18 = inlined_call_operand.hbm [shape: f32[2,2,32], index: 18, kind: output, shape index: {2}]  }
   0x1   :  { %3450 = sst [smem:[#allocation31_spill]] %s3423_s0 }
   0x2   :  { %3451 = sst [smem:[#allocation32_spill]] %s3424_s1 }
   0x3   :  { %3452 = sst [smem:[#allocation33_spill]] %s3425_s2 }
   0x4   :  { %3453 = sst [smem:[#allocation34_spill]] %s3439_s16 }
   0x5   :  { %24 = vsyncpa [#allocation3], 0 }
   0x6   :  { %25 = vsyncpa [#allocation6], 0 }
   0x7   :  { %26 = vsyncpa [#allocation9], 0 }
   0x8   :  { %27 = vsyncpa [#allocation12], 0 }
   0x9   :  { %28 = vsyncpa [#allocation15], 0 }
   0xa   :  { %29 = vsyncpa [#allocation18], 0 }
   0xb   :  { %30 = vsyncpa [#allocation4], 0 }
   0xc   :  { %31 = vsyncpa [#allocation21], 0  ;;  %s2842_s27 = smov [#allocation5]   ;;  %s2843_s29 = smov [#allocation8]  }
   0xd   :  { %s49_s28 = sshll.u32 %s2842_s27, 4  ;;  %s73_s30 = sshll.u32 %s2843_s29, 4  ;;  %s50_s28 = int_to_ptr.vmem [resolvable:$true] %s49_s28  ;;  %s2963_s30 = int_to_ptr.vmem [resolvable:$true] %s73_s30 }
   0xe   :  { %s3454_s1 = sld [smem:[#allocation32_spill]] }
  0x14   :  { %s2540_s20 = scalar_lea.hbm %s3454_s1, 64 }
  0x15   :  { %p2541_p0 = scmp.ne.s32.totalorder %s3454_s1, %s2540_s20  ;;  %p2544_p1 = scmp.lt.u32.totalorder %s2540_s20, %s3454_s1 }
  0x17   :  { %p2546_p2 = pnand %p2544_p1, %p2541_p0 }
  0x19   :  { %2549 = shalt.err (!%p2546_p2)
}
  0x1a   :  { %s2550_s24 = scalar_lea.vmem %s50_s28, 64  ;;  %p2555_p4 = scmp.lt.s32.totalorder %s50_s28, %s50_s28 }
  0x1b   :  { %p2551_p3 = scmp.ne.s32.totalorder %s50_s28, %s2550_s24  ;;  %p2556_p5 = scmp.lt.s32.totalorder %s2550_s24, %s2550_s24 }
  0x1d   :  { %p2557_p6 = por %p2556_p5, %p2555_p4 }
  0x1f   :  { %p2558_p7 = pnand %p2557_p6, %p2551_p3 }
  0x21   :  { %2561 = shalt.err (!%p2558_p7)
}
  0x22   :  { %s3445_s25 = smov 32   ;;  %s3447_s26 = smov 2  }
  0x23   :  { %55 = dma.hbm_to_vmem [thread:$0]  %s3454_s1, 64, %s50_s28, [#allocation6], %s3445_s25, %s3445_s25, %s3447_s26  }
  0x24   :  { %s2562_s20 = scalar_lea.hbm %s3426_s3, 256 }
  0x25   :  { %p2563_p8 = scmp.ne.s32.totalorder %s3426_s3, %s2562_s20  ;;  %p2566_p9 = scmp.lt.u32.totalorder %s2562_s20, %s3426_s3 }
  0x27   :  { %p2568_p10 = pnand %p2566_p9, %p2563_p8 }
  0x29   :  { %2571 = shalt.err (!%p2568_p10)
}
  0x2a   :  { %s2572_s24 = scalar_lea.vmem %s2963_s30, 256  ;;  %p2577_p12 = scmp.lt.s32.totalorder %s2963_s30, %s2963_s30 }
  0x2b   :  { %p2573_p11 = scmp.ne.s32.totalorder %s2963_s30, %s2572_s24  ;;  %p2578_p13 = scmp.lt.s32.totalorder %s2572_s24, %s2572_s24 }
  0x2d   :  { %p2579_p0 = por %p2578_p13, %p2577_p12 }
  0x2f   :  { %p2580_p1 = pnand %p2579_p0, %p2573_p11 }
  0x31   :  { %2583 = shalt.err (!%p2580_p1)
}
  0x32   :  { %s2846_s28 = smov 128   ;;  %s2847_s1 = smov 8  }
  0x33   :  { %79 = dma.hbm_to_vmem [thread:$0]  %s3426_s3, 256, %s2963_s30, [#allocation9], %s2846_s28, %s2846_s28, %s2847_s1  }
  0x34   :  { %s2848_s0 = smov [#allocation11]   ;;  %s2849_s20 = smov [#allocation14]  }
  0x35   :  { %s99_s19 = sshll.u32 %s2848_s0, 4  ;;  %s129_s21 = sshll.u32 %s2849_s20, 4  ;;  %s100_s19 = int_to_ptr.vmem [resolvable:$true] %s99_s19  ;;  %s3000_s21 = int_to_ptr.vmem [resolvable:$true] %s129_s21 }
  0x36   :  { %s2584_s23 = scalar_lea.hbm %s3429_s6, 512 }
  0x37   :  { %p2585_p2 = scmp.ne.s32.totalorder %s3429_s6, %s2584_s23  ;;  %p2588_p3 = scmp.lt.u32.totalorder %s2584_s23, %s3429_s6 }
  0x39   :  { %p2590_p4 = pnand %p2588_p3, %p2585_p2 }
  0x3b   :  { %2593 = shalt.err (!%p2590_p4)
}
  0x3c   :  { %s2594_s3 = scalar_lea.vmem %s100_s19, 512  ;;  %p2599_p6 = scmp.lt.s32.totalorder %s100_s19, %s100_s19 }
  0x3d   :  { %p2595_p5 = scmp.ne.s32.totalorder %s100_s19, %s2594_s3  ;;  %p2600_p7 = scmp.lt.s32.totalorder %s2594_s3, %s2594_s3 }
  0x3f   :  { %p2601_p8 = por %p2600_p7, %p2599_p6 }
  0x41   :  { %p2602_p9 = pnand %p2601_p8, %p2595_p5 }
  0x43   :  { %2605 = shalt.err (!%p2602_p9)
}
  0x44   :  { %105 = dma.hbm_to_vmem [thread:$0]  %s3429_s6, 512, %s100_s19, [#allocation12], %s2846_s28, %s2846_s28, %s2847_s1  }
  0x45   :  { %s2606_s16 = scalar_lea.hbm %s3434_s11, 512 }
  0x46   :  { %p2607_p10 = scmp.ne.s32.totalorder %s3434_s11, %s2606_s16  ;;  %p2610_p11 = scmp.lt.u32.totalorder %s2606_s16, %s3434_s11 }
  0x48   :  { %p2612_p12 = pnand %p2610_p11, %p2607_p10 }
  0x4a   :  { %2615 = shalt.err (!%p2612_p12)
}
  0x4b   :  { %s2616_s2 = scalar_lea.vmem %s3000_s21, 512  ;;  %p2621_p0 = scmp.lt.s32.totalorder %s3000_s21, %s3000_s21 }
  0x4c   :  { %p2617_p13 = scmp.ne.s32.totalorder %s3000_s21, %s2616_s2  ;;  %p2622_p1 = scmp.lt.s32.totalorder %s2616_s2, %s2616_s2 }
  0x4e   :  { %p2623_p2 = por %p2622_p1, %p2621_p0 }
  0x50   :  { %p2624_p3 = pnand %p2623_p2, %p2617_p13 }
  0x52   :  { %2627 = shalt.err (!%p2624_p3)
}
  0x53   :  { %135 = dma.hbm_to_vmem [thread:$0]  %s3434_s11, 512, %s3000_s21, [#allocation15], %s2846_s28, %s2846_s28, %s2847_s1  }
  0x54   :  { %s2850_s23 = smov [#allocation2]   ;;  %s2851_s3 = smov [#allocation7]  }
  0x55   :  { %s37_s24 = sshll.u32 %s2850_s23, 4  ;;  %s61_s30 = sshll.u32 %s2851_s3, 4  ;;  %s38_s24 = int_to_ptr.vmem [resolvable:$true] %s37_s24  ;;  %s3037_s30 = int_to_ptr.vmem [resolvable:$true] %s61_s30 }
  0x56   :  { %s3455_s29 = sld [smem:[#allocation31_spill]] }
  0x5c   :  { %s2628_s16 = scalar_lea.hbm %s3455_s29, 128 }
  0x5d   :  { %p2629_p4 = scmp.ne.s32.totalorder %s3455_s29, %s2628_s16  ;;  %p2632_p5 = scmp.lt.u32.totalorder %s2628_s16, %s3455_s29 }
  0x5f   :  { %p2634_p6 = pnand %p2632_p5, %p2629_p4 }
  0x61   :  { %2637 = shalt.err (!%p2634_p6)
}
  0x62   :  { %s2638_s11 = scalar_lea.vmem %s38_s24, 128  ;;  %p2643_p8 = scmp.lt.s32.totalorder %s38_s24, %s38_s24 }
  0x63   :  { %p2639_p7 = scmp.ne.s32.totalorder %s38_s24, %s2638_s11  ;;  %p2644_p9 = scmp.lt.s32.totalorder %s2638_s11, %s2638_s11 }
  0x65   :  { %p2645_p10 = por %p2644_p9, %p2643_p8 }
  0x67   :  { %p2646_p11 = pnand %p2645_p10, %p2639_p7 }
  0x69   :  { %2649 = shalt.err (!%p2646_p11)
}
  0x6a   :  { %s3456_s21 = smov 2   ;;  %s3457_s2 = smov 32  }
  0x6b   :  { %43 = dma.hbm_to_vmem [thread:$0]  %s3455_s29, 128, %s38_s24, [#allocation3], %s3457_s2, %s3457_s2, %s3456_s21  }
  0x6c   :  { %s3458_s27 = sld [smem:[#allocation33_spill]] }
  0x72   :  { %s2650_s25 = scalar_lea.hbm %s3458_s27, 64 }
  0x73   :  { %p2651_p12 = scmp.ne.s32.totalorder %s3458_s27, %s2650_s25  ;;  %p2654_p13 = scmp.lt.u32.totalorder %s2650_s25, %s3458_s27 }
  0x75   :  { %p2656_p0 = pnand %p2654_p13, %p2651_p12 }
  0x77   :  { %2659 = shalt.err (!%p2656_p0)
}
  0x78   :  { %s2660_s22 = scalar_lea.vmem %s3037_s30, 64  ;;  %p2665_p2 = scmp.lt.s32.totalorder %s3037_s30, %s3037_s30 }
  0x79   :  { %p2661_p1 = scmp.ne.s32.totalorder %s3037_s30, %s2660_s22  ;;  %p2666_p3 = scmp.lt.s32.totalorder %s2660_s22, %s2660_s22 }
  0x7b   :  { %p2667_p4 = por %p2666_p3, %p2665_p2 }
  0x7d   :  { %p2668_p5 = pnand %p2667_p4, %p2661_p1 }
  0x7f   :  { %2671 = shalt.err (!%p2668_p5)
}
  0x80   :  { %67 = dma.hbm_to_vmem [thread:$0]  %s3458_s27, 64, %s3037_s30, [#allocation6], %s3457_s2, %s3457_s2, %s3456_s21  }
  0x81   :  { %s2852_s11 = smov [#allocation10]   ;;  %s2853_s19 = smov [#allocation13]  }
  0x82   :  { %s87_s6 = sshll.u32 %s2852_s11, 4  ;;  %s115_s23 = sshll.u32 %s2853_s19, 4  ;;  %s88_s6 = int_to_ptr.vmem [resolvable:$true] %s87_s6  ;;  %s3074_s23 = int_to_ptr.vmem [resolvable:$true] %s115_s23 }
  0x83   :  { %s2672_s16 = scalar_lea.hbm %s3428_s5, 512 }
  0x84   :  { %p2673_p6 = scmp.ne.s32.totalorder %s3428_s5, %s2672_s16  ;;  %p2676_p7 = scmp.lt.u32.totalorder %s2672_s16, %s3428_s5 }
  0x86   :  { %p2678_p8 = pnand %p2676_p7, %p2673_p6 }
  0x88   :  { %2681 = shalt.err (!%p2678_p8)
}
  0x89   :  { %s2682_s30 = scalar_lea.vmem %s88_s6, 512  ;;  %p2687_p10 = scmp.lt.s32.totalorder %s88_s6, %s88_s6 }
  0x8a   :  { %p2683_p9 = scmp.ne.s32.totalorder %s88_s6, %s2682_s30  ;;  %p2688_p11 = scmp.lt.s32.totalorder %s2682_s30, %s2682_s30 }
  0x8c   :  { %p2689_p12 = por %p2688_p11, %p2687_p10 }
  0x8e   :  { %p2690_p13 = pnand %p2689_p12, %p2683_p9 }
  0x90   :  { %2693 = shalt.err (!%p2690_p13)
}
  0x91   :  { %93 = dma.hbm_to_vmem [thread:$0]  %s3428_s5, 512, %s88_s6, [#allocation9], %s2846_s28, %s2846_s28, %s2847_s1  }
  0x92   :  { %s2694_s19 = scalar_lea.hbm %s3432_s9, 512 }
  0x93   :  { %p2695_p0 = scmp.ne.s32.totalorder %s3432_s9, %s2694_s19  ;;  %p2698_p1 = scmp.lt.u32.totalorder %s2694_s19, %s3432_s9 }
  0x95   :  { %p2700_p2 = pnand %p2698_p1, %p2695_p0 }
  0x97   :  { %2703 = shalt.err (!%p2700_p2)
}
  0x98   :  { %s2704_s0 = scalar_lea.vmem %s3074_s23, 512  ;;  %p2709_p4 = scmp.lt.s32.totalorder %s3074_s23, %s3074_s23 }
  0x99   :  { %p2705_p3 = scmp.ne.s32.totalorder %s3074_s23, %s2704_s0  ;;  %p2710_p5 = scmp.lt.s32.totalorder %s2704_s0, %s2704_s0 }
  0x9b   :  { %p2711_p6 = por %p2710_p5, %p2709_p4 }
  0x9d   :  { %p2712_p7 = pnand %p2711_p6, %p2705_p3 }
  0x9f   :  { %2715 = shalt.err (!%p2712_p7)
}
  0xa0   :  { %121 = dma.hbm_to_vmem [thread:$0]  %s3432_s9, 512, %s3074_s23, [#allocation12], %s2846_s28, %s2846_s28, %s2847_s1  }
  0xa1   :  { %s2854_s20 = smov [#allocation16]   ;;  %s2855_s30 = smov [#allocation17]  }
  0xa2   :  { %s141_s22 = sshll.u32 %s2854_s20, 4  ;;  %s155_s27 = sshll.u32 %s2855_s30, 4  ;;  %s142_s22 = int_to_ptr.vmem [resolvable:$true] %s141_s22  ;;  %s3111_s27 = int_to_ptr.vmem [resolvable:$true] %s155_s27 }
  0xa3   :  { %s2716_s11 = scalar_lea.hbm %s3435_s12, 512 }
  0xa4   :  { %p2717_p8 = scmp.ne.s32.totalorder %s3435_s12, %s2716_s11  ;;  %p2720_p9 = scmp.lt.u32.totalorder %s2716_s11, %s3435_s12 }
  0xa6   :  { %p2722_p10 = pnand %p2720_p9, %p2717_p8 }
  0xa8   :  { %2725 = shalt.err (!%p2722_p10)
}
  0xa9   :  { %s2726_s9 = scalar_lea.vmem %s142_s22, 512  ;;  %p2731_p12 = scmp.lt.s32.totalorder %s142_s22, %s142_s22 }
  0xaa   :  { %p2727_p11 = scmp.ne.s32.totalorder %s142_s22, %s2726_s9  ;;  %p2732_p13 = scmp.lt.s32.totalorder %s2726_s9, %s2726_s9 }
  0xac   :  { %p2733_p0 = por %p2732_p13, %p2731_p12 }
  0xae   :  { %p2734_p1 = pnand %p2733_p0, %p2727_p11 }
  0xb0   :  { %2737 = shalt.err (!%p2734_p1)
}
  0xb1   :  { %147 = dma.hbm_to_vmem [thread:$0]  %s3435_s12, 512, %s142_s22, [#allocation15], %s2846_s28, %s2846_s28, %s2847_s1  }
  0xb2   :  { %s2738_s6 = scalar_lea.hbm %s3437_s14, 512 }
  0xb3   :  { %p2739_p2 = scmp.ne.s32.totalorder %s3437_s14, %s2738_s6  ;;  %p2742_p3 = scmp.lt.u32.totalorder %s2738_s6, %s3437_s14 }
  0xb5   :  { %p2744_p4 = pnand %p2742_p3, %p2739_p2 }
  0xb7   :  { %2747 = shalt.err (!%p2744_p4)
}
  0xb8   :  { %s2748_s11 = scalar_lea.vmem %s3111_s27, 512  ;;  %p2753_p6 = scmp.lt.s32.totalorder %s3111_s27, %s3111_s27 }
  0xb9   :  { %p2749_p5 = scmp.ne.s32.totalorder %s3111_s27, %s2748_s11  ;;  %p2754_p7 = scmp.lt.s32.totalorder %s2748_s11, %s2748_s11 }
  0xbb   :  { %p2755_p8 = por %p2754_p7, %p2753_p6 }
  0xbd   :  { %p2756_p9 = pnand %p2755_p8, %p2749_p5 }
  0xbf   :  { %2759 = shalt.err (!%p2756_p9)
}
  0xc0   :  { %161 = dma.hbm_to_vmem [thread:$0]  %s3437_s14, 512, %s3111_s27, [#allocation18], %s2846_s28, %s2846_s28, %s2847_s1  }
  0xc1   :  { %2826 = dma.done.wait [#allocation3], 128  }
  0xc2   :  { %2827 = vsyncadd [#allocation3], 4294967168 }
  0xc3   :  { %2828 = dma.done.wait [#allocation6], 128  }
  0xc4   :  { %2829 = vsyncadd [#allocation6], 4294967168 }
  0xc5   :  { %2830 = dma.done.wait [#allocation9], 768  }
  0xc6   :  { %2831 = vsyncadd [#allocation9], 4294966528 }
  0xc7   :  { %2832 = dma.done.wait [#allocation12], 1024  }
  0xc8   :  { %2833 = vsyncadd [#allocation12], 4294966272 }
  0xc9   :  { %2834 = dma.done.wait [#allocation15], 1024  }
  0xca   :  { %2835 = vsyncadd [#allocation15], 4294966272 }
  0xcb   :  { %2836 = dma.done.wait [#allocation18], 512  }
  0xcc   :  { %2837 = vsyncadd [#allocation18], 4294966784  ;;  %v2856_v0 = vmov 0.0|0.0   ;;  %v222_v1 = vlaneseq  ;;  %vm2857_vm0 = vmmov 0   ;;  %v2858_v2 = vmov 0.0   ;;  %v198_v7 = vld [vmem:[#allocation10] sm:$0xff] }
  0xcd   :  { %2360 = vmatprep.subr.bf16.mxu0 %v2856_v0  ;;  %2366 = vmatprep.subr.bf16.mxu1 %v2856_v0  ;;  %v2859_v3 = vmov 1983009808   ;;  %v199_v8 = vld [vmem:[#allocation10 + $0x8] sm:$0xff]  ;;  %v202_v9 = vld [vmem:[#allocation11] sm:$0xff]  ;;  %v200_v12 = vld [vmem:[#allocation10 + $0x10] sm:$0xff]  ;;  %vm234_vm1 = vcmask 261120  }
  0xce   :  { %2205 = vmatprep.mubr.msk.f32.mxu0 %vm2857_vm0, %v2858_v2  ;;  %v220_v4 = vunpack.c.l.s4 %v2859_v3  ;;  %2216 = vmatprep.mubr.msk.f32.mxu1 %vm2857_vm0, %v2858_v2  ;;  %v3155_v6 = vshrl.u32 %v222_v1, 7  ;;  %v2361_v10 = vpack.c.bf16 %v199_v8, %v198_v7  ;;  %v203_v11 = vld [vmem:[#allocation11 + $0x8] sm:$0xff]  ;;  %v201_v13 = vld [vmem:[#allocation10 + $0x18] sm:$0xff]  ;;  %v204_v15 = vld [vmem:[#allocation11 + $0x10] sm:$0xff]  ;;  %vm742_vm2 = vcmask 1041408   ;;  %s2864_s20 = smov [#allocation20]  }
  0xcf   :  { %v3157_v14 = vpack.c.bf16 %v203_v11, %v202_v9  ;;  %v205_v16 = vld [vmem:[#allocation11 + $0x18] sm:$0xff]  ;;  %v194_v17 = vld [vmem:[#allocation2] sm:$0x3]  ;;  %v2364_v19 = vpack.c.bf16 %v201_v13, %v200_v12  ;;  %v195_v20 = vld [vmem:[#allocation2 + $0x2] sm:$0x3]  ;;  %vm744_vm3 = vcmask 1043456  }
  0xd0   :  { %v221_v5 = vunpack.c.0.s8 %v220_v4  ;;  %2362 = vmatpush3.bf16.msra.mxu0 %v2361_v10  ;;  %v196_v21 = vld [vmem:[#allocation2 + $0x4] sm:$0x3]  ;;  %v197_v22 = vld [vmem:[#allocation2 + $0x6] sm:$0x3]  ;;  %v2370_v23 = vpack.c.bf16 %v205_v16, %v204_v15  ;;  %v217_v24 = vcombine.low %v194_v17, %v195_v20  ;;  %v307_v29 = vld [vmem:[#allocation5] sm:$0x3] }
  0xd1   :  { %2368 = vmatpush3.bf16.msra.mxu1 %v3157_v14  ;;  %2363 = vmatprep.subr.bf16.mxu0 %v2856_v0  ;;  %v218_v25 = vcombine.low %v196_v21, %v197_v22  ;;  %v2093_v30 = vld [vmem:[%s3430_s7] ss:$0 sm:$0xff]  ;;  %v308_v38 = vld [vmem:[#allocation7] sm:$0x3]  ;;  %s2860_s7 = smov 64   ;;  %vm746_vm4 = vcmask 1045504  }
  0xd2   :  { %v224_v18 = vsub.s32 %v221_v5, %v3155_v6  ;;  %2369 = vmatprep.subr.bf16.mxu1 %v2856_v0  ;;  %vm1402_vm5 = vcmask 1040384   ;;  %vm1407_vm6 = vcmask 1042432   ;;  %vm1614_vm11 = vcmask 60416   ;;  %s2057_s30 = sshll.u32 %s2864_s20, 4  ;;  %s2058_s30 = int_to_ptr.vmem [resolvable:$true] %s2057_s30 }
  0xd3   :  { %vm735_vm13 = vcmask 261126   ;;  %vm1637_vm14 = vcmask 64512   ;;  %s2760_s24 = scalar_lea.vmem %s2058_s30, 64  ;;  %p2765_p11 = scmp.lt.s32.totalorder %s2058_s30, %s2058_s30 }
  0xd4   :  { %v225_v26 = vrot.slane %v217_v24, %v224_v18  ;;  %v232_v27 = vrot.slane %v218_v25, %v224_v18  ;;  %2365 = vmatpush3.bf16.msra.mxu0 %v2364_v19  ;;  %p2761_p10 = scmp.ne.s32.totalorder %s2058_s30, %s2760_s24  ;;  %p2766_p12 = scmp.lt.s32.totalorder %s2760_s24, %s2760_s24 }
  0xd5   :  { %2371 = vmatpush3.bf16.msra.mxu1 %v2370_v23  ;;  %2372 = vmatprep.subr.bf16.mxu0 %v2856_v0 }
  0xd6   :  { %v233_v28 = vcombine.low %v225_v26, %v232_v27  ;;  %2378 = vmatprep.subr.bf16.mxu1 %v2856_v0  ;;  %p2767_p13 = por %p2766_p12, %p2765_p11 }
  0xd8   :  { %2206 = vmatmul.mubr.msk.f32.vlgmr.msra.gmra.mrb[0].mxu0 %vm234_vm1, %v233_v28  ;;  %2217 = vmatmul.mubr.msk.f32.vlgmr.msra.gmra.mrb[0].mxu1 %vm234_vm1, %v307_v29  ;;  %p2768_p0 = pnand %p2767_p13, %p2761_p10 }
  0xd9   :  { %2374 = vmatpush3.bf16.msra.mxu0 %v3157_v14  ;;  %2227 = vmatprep.mubr.msk.f32.mxu0 %vm2857_vm0, %v2858_v2 }
  0xda   :  { %2375 = vmatprep.subr.bf16.mxu0 %v2856_v0  ;;  %2380 = vmatpush3.bf16.msra.mxu1 %v3157_v14 }
  0xdb   :  { %2238 = vmatprep.mubr.msk.f32.mxu1 %vm2857_vm0, %v2858_v2  ;;  %2381 = vmatprep.subr.bf16.mxu1 %v2856_v0 }
  0xdd   :  { %2377 = vmatpush3.bf16.msra.mxu0 %v2370_v23 }
  0xde   :  { %2384 = vmatprep.subr.bf16.mxu0 %v2856_v0  ;;  %2383 = vmatpush3.bf16.msra.mxu1 %v2370_v23 }
  0xdf   :  { %2390 = vmatprep.subr.bf16.mxu1 %v2856_v0 }
 0x1ab   :  { %v303_v31 = vpop.f32.mrb[0].mxu0  ;;  %v378_v34 = vpop.f32.mrb[0].mxu1 }
 0x1ac   :  { %v3180_v32 = vadd.f32 %v2093_v30, %v303_v31  ;;  %v2207_v33 = vpop.f32.mrb[1].mxu0  ;;  %v2218_v35 = vpop.f32.mrb[1].mxu1 }
 0x1ae   :  { %v382_v36 = vadd.f32 %v378_v34, %v3180_v32 }
 0x1b0   :  { %2466 = vtanh.f32 %v382_v36  ;;  %v2096_v39 = vmul.f32 -1.442695, %v382_v36 }
 0x1b2   :  { %2468 = vpow2.f32 %v2096_v39 }
 0x1ba   :  { %v2467_v37 = vpop.eup %2466 }
 0x1bb   :  { %396 = vrot.lane.b32.xlu0 %v2467_v37, %s3457_s2 }
 0x1bc   :  { %v2469_v40 = vpop.eup %2468 }
 0x1bd   :  { %v386_v41 = vadd.f32 1.0, %v2469_v40 }
 0x1bf   :  { %391 = vrot.lane.b32.xlu0 %v308_v38, %s3457_s2  ;;  %2470 = vrcp.f32 %v386_v41 }
 0x1c9   :  { %v2471_v42 = vpop.eup %2470 }
 0x22d   :  { %v397_v43 = vpop.permute.xlu0 %396 }
 0x22e   :  { %v399_v44 = vmul.f32 %v2471_v42, %v397_v43 }
 0x230   :  { %401 = vrot.lane.b32.xlu1 %v399_v44, %s3457_s2 }
 0x231   :  { %v392_v45 = vpop.permute.xlu0 %391 }
 0x232   :  { %v394_v46 = vmul.f32 %v2471_v42, %v392_v45 }
 0x2a2   :  { %v402_v47 = vpop.permute.xlu1 %401 }
 0x2a3   :  { %v404_v48 = vadd.f32 %v402_v47, %v394_v46 }
 0x2a5   :  { %2472 = vtanh.f32 %v404_v48  ;;  %v498_v3 = vrot.slane %v404_v48, 6 }
 0x2af   :  { %v2473_v49 = vpop.eup %2472 }
 0x2b0   :  { %407 = vrot.lane.b32.xlu1 %v2473_v49, %s3457_s2 }
 0x322   :  { %v408_v50 = vpop.permute.xlu1 %407 }
 0x323   :  { %v3187_v51 = vmul.f32 %v2471_v42, %v408_v50 }
 0x325   :  { %412 = vrot.lane.b32.xlu0 %v3187_v51, %s2860_s7 }
 0x397   :  { %v413_v52 = vpop.permute.xlu0 %412 }
 0x398   :  { %2228 = vmatmul.mubr.msk.f32.vlgmr.msra.gmra.mrb[2].mxu0 %vm234_vm1, %v413_v52  ;;  %v752_v52 = vld [vmem:[#allocation13] sm:$0xff] }
 0x399   :  { %2386 = vmatpush3.bf16.msra.mxu0 %v3157_v14  ;;  %2249 = vmatprep.mubr.msk.f32.mxu0 %vm2857_vm0, %v2858_v2 }
 0x39a   :  { %2387 = vmatprep.subr.bf16.mxu0 %v2856_v0 }
 0x39d   :  { %2389 = vmatpush3.bf16.msra.mxu0 %v2370_v23 }
 0x39e   :  { %2396 = vmatprep.subr.bf16.mxu0 %v2856_v0 }
 0x46b   :  { %v482_v53 = vpop.f32.mrb[2].mxu0 }
 0x46c   :  { %v487_v54 = vrot.slane %v482_v53, 6  ;;  %v2229_v55 = vpop.f32.mrb[3].mxu0 }
 0x46d   :  { %v750_v55 = vld [vmem:[%s3431_s8 + $0x10] sm:$0xff] }
 0x46e   :  { %v489_v56 = vadd.f32 %v487_v54, %v3180_v32  ;;  %v753_v54 = vld [vmem:[#allocation13 + $0x8] sm:$0xff] }
 0x470   :  { %2474 = vtanh.f32 %v489_v56  ;;  %v2098_v58 = vmul.f32 -1.442695, %v489_v56  ;;  %v751_v56 = vld [vmem:[%s3431_s8 + $0x18] sm:$0xff] }
 0x472   :  { %2476 = vpow2.f32 %v2098_v58  ;;  %v754_v58 = vld [vmem:[#allocation13 + $0x10] sm:$0xff] }
 0x47a   :  { %v2475_v57 = vpop.eup %2474 }
 0x47b   :  { %502 = vrot.lane.b32.xlu1 %v2475_v57, %s3457_s2  ;;  %v3233_v57 = vpack.c.bf16 %v753_v54, %v752_v52 }
 0x47c   :  { %v2477_v59 = vpop.eup %2476 }
 0x47d   :  { %v493_v60 = vadd.f32 1.0, %v2477_v59  ;;  %v755_v59 = vld [vmem:[#allocation13 + $0x18] sm:$0xff] }
 0x47f   :  { %2478 = vrcp.f32 %v493_v60  ;;  %v2394_v60 = vpack.c.bf16 %v751_v56, %v750_v55 }
 0x489   :  { %v2479_v61 = vpop.eup %2478 }
 0x48a   :  { %v500_v4 = vmul.f32 %v2479_v61, %v498_v3 }
 0x4ed   :  { %v503_v62 = vpop.permute.xlu1 %502 }
 0x4ee   :  { %v505_v63 = vmul.f32 %v2479_v61, %v503_v62 }
 0x4f0   :  { %507 = vrot.lane.b32.xlu0 %v505_v63, %s3457_s2  ;;  %v839_v63 = vld [vmem:[#allocation5 + $0x2] sm:$0x3] }
 0x562   :  { %v508_v5 = vpop.permute.xlu0 %507 }
 0x563   :  { %v510_v7 = vadd.f32 %v508_v5, %v500_v4 }
 0x565   :  { %2480 = vtanh.f32 %v510_v7  ;;  %v605_v24 = vrot.slane %v510_v7, 6  ;;  %v841_v7 = vld [vmem:[#allocation7 + $0x2] sm:$0x3] }
 0x56f   :  { %v2481_v8 = vpop.eup %2480 }
 0x570   :  { %513 = vrot.lane.b32.xlu1 %v2481_v8, %s3457_s2 }
 0x5e2   :  { %v514_v9 = vpop.permute.xlu1 %513 }
 0x5e3   :  { %v516_v10 = vmul.f32 %v2479_v61, %v514_v9  ;;  %v2400_v61 = vpack.c.bf16 %v755_v59, %v754_v58 }
 0x5e5   :  { %v518_v11 = vrot.slane %v516_v10, 2  ;;  %v743_v31 = vsel %vm742_vm2, %v3187_v51, %v516_v10  ;;  %v749_v51 = vld [vmem:[%s3431_s8 + $0x8] sm:$0xff] }
 0x5e7   :  { %519 = vrot.lane.b32.xlu0 %v518_v11, %s2860_s7  ;;  %v2103_v11 = vld [vmem:[%s3433_s10] ss:$0 sm:$0xff] }
 0x659   :  { %v520_v12 = vpop.permute.xlu0 %519 }
 0x65a   :  { %2239 = vmatmul.mubr.msk.f32.vlgmr.msra.gmra.mrb[2].mxu1 %vm234_vm1, %v520_v12 }
 0x65b   :  { %2260 = vmatprep.mubr.msk.f32.mxu1 %vm2857_vm0, %v2858_v2 }
 0x72d   :  { %v589_v13 = vpop.f32.mrb[2].mxu1 }
 0x72e   :  { %v594_v14 = vrot.slane %v589_v13, 4  ;;  %v2240_v15 = vpop.f32.mrb[3].mxu1 }
 0x730   :  { %v596_v16 = vadd.f32 %v594_v14, %v3180_v32 }
 0x732   :  { %2482 = vtanh.f32 %v596_v16  ;;  %v2100_v18 = vmul.f32 -1.442695, %v596_v16 }
 0x734   :  { %2484 = vpow2.f32 %v2100_v18 }
 0x73c   :  { %v2483_v17 = vpop.eup %2482 }
 0x73d   :  { %609 = vrot.lane.b32.xlu1 %v2483_v17, %s3457_s2 }
 0x73e   :  { %v2485_v19 = vpop.eup %2484 }
 0x73f   :  { %v600_v20 = vadd.f32 1.0, %v2485_v19 }
 0x741   :  { %2486 = vrcp.f32 %v600_v20 }
 0x74b   :  { %v2487_v21 = vpop.eup %2486 }
 0x74c   :  { %v607_v25 = vmul.f32 %v2487_v21, %v605_v24 }
 0x7af   :  { %v610_v22 = vpop.permute.xlu1 %609 }
 0x7b0   :  { %v612_v23 = vmul.f32 %v2487_v21, %v610_v22 }
 0x7b2   :  { %614 = vrot.lane.b32.xlu0 %v612_v23, %s3457_s2 }
 0x824   :  { %v615_v26 = vpop.permute.xlu0 %614 }
 0x825   :  { %v617_v27 = vadd.f32 %v615_v26, %v607_v25 }
 0x827   :  { %2488 = vtanh.f32 %v617_v27  ;;  %v712_v47 = vrot.slane %v617_v27, 6 }
 0x831   :  { %v2489_v28 = vpop.eup %2488 }
 0x832   :  { %620 = vrot.lane.b32.xlu1 %v2489_v28, %s3457_s2 }
 0x8a4   :  { %v621_v29 = vpop.permute.xlu1 %620 }
 0x8a5   :  { %v623_v30 = vmul.f32 %v2487_v21, %v621_v29 }
 0x8a7   :  { %v625_v33 = vrot.slane %v623_v30, 4  ;;  %v745_v34 = vsel %vm744_vm3, %v743_v31, %v623_v30 }
 0x8a9   :  { %626 = vrot.lane.b32.xlu0 %v625_v33, %s2860_s7 }
 0x91b   :  { %v627_v35 = vpop.permute.xlu0 %626 }
 0x91c   :  { %2250 = vmatmul.mubr.msk.f32.vlgmr.msra.gmra.mrb[4].mxu0 %vm234_vm1, %v627_v35 }
 0x91d   :  { %2271 = vmatprep.mubr.msk.f32.mxu0 %vm2857_vm0, %v2858_v2  ;;  %2398 = vmatpush3.bf16.msra.mxu0 %v3233_v57 }
 0x91e   :  { %2399 = vmatprep.subr.bf16.mxu0 %v2856_v0 }
 0x921   :  { %2401 = vmatpush3.bf16.msra.mxu0 %v2400_v61 }
 0x922   :  { %2408 = vmatprep.subr.bf16.mxu0 %v2856_v0 }
 0x924   :  { %2272 = vmatmul.mubr.msk.f32.vlgmr.msra.gmra.mrb[6].mxu0 %vm234_vm1, %v839_v63 }
 0x925   :  { %2410 = vmatpush3.bf16.msra.mxu0 %v3233_v57  ;;  %2293 = vmatprep.mubr.msk.f32.mxu0 %vm2857_vm0, %v2858_v2 }
 0x926   :  { %2411 = vmatprep.subr.bf16.mxu0 %v2856_v0 }
 0x929   :  { %2413 = vmatpush3.bf16.msra.mxu0 %v2400_v61 }
 0x92a   :  { %2317 = vmatprep.subr.mxu0 %v2858_v2 }
 0x9ef   :  { %v696_v36 = vpop.f32.mrb[4].mxu0 }
 0x9f0   :  { %v701_v37 = vrot.slane %v696_v36, 2  ;;  %v2251_v38 = vpop.f32.mrb[5].mxu0 }
 0x9f2   :  { %v703_v39 = vadd.f32 %v701_v37, %v3180_v32  ;;  %v748_v32 = vld [vmem:[%s3431_s8] sm:$0xff] }
 0x9f3   :  { %v2391_v53 = vpack.c.bf16 %v749_v51, %v748_v32 }
 0x9f4   :  { %2490 = vtanh.f32 %v703_v39  ;;  %v2102_v41 = vmul.f32 -1.442695, %v703_v39 }
 0x9f5   :  { %2392 = vmatpush3.bf16.msra.mxu1 %v2391_v53 }
 0x9f6   :  { %2492 = vpow2.f32 %v2102_v41  ;;  %2393 = vmatprep.subr.bf16.mxu1 %v2856_v0 }
 0x9f7   :  { %v911_v9 = vpop.f32.mrb[6].mxu0 }
 0x9f8   :  { %v2273_v10 = vpop.f32.mrb[7].mxu0 }
 0x9f9   :  { %2395 = vmatpush3.bf16.msra.mxu1 %v2394_v60 }
 0x9fa   :  { %2402 = vmatprep.subr.bf16.mxu1 %v2856_v0 }
 0x9fe   :  { %v2491_v40 = vpop.eup %2490 }
 0x9ff   :  { %716 = vrot.lane.b32.xlu1 %v2491_v40, %s3457_s2 }
 0xa00   :  { %v2493_v42 = vpop.eup %2492 }
 0xa01   :  { %v707_v43 = vadd.f32 1.0, %v2493_v42 }
 0xa03   :  { %2494 = vrcp.f32 %v707_v43 }
 0xa0d   :  { %v2495_v44 = vpop.eup %2494 }
 0xa0e   :  { %v714_v48 = vmul.f32 %v2495_v44, %v712_v47 }
 0xa71   :  { %v717_v45 = vpop.permute.xlu1 %716 }
 0xa72   :  { %v719_v46 = vmul.f32 %v2495_v44, %v717_v45 }
 0xa74   :  { %721 = vrot.lane.b32.xlu0 %v719_v46, %s3457_s2 }
 0xae6   :  { %v722_v49 = vpop.permute.xlu0 %721 }
 0xae7   :  { %v3218_v50 = vadd.f32 %v722_v49, %v714_v48  ;;  %v2861_v48 = vmov 1966171168  }
 0xae8   :  { %v1277_v49 = vunpack.c.l.s4 %v2861_v48 }
 0xae9   :  { %2496 = vtanh.f32 %v3218_v50 }
 0xaea   :  { %v1278_v32 = vunpack.c.0.s8 %v1277_v49 }
 0xaec   :  { %v3279_v51 = vsub.s32 %v1278_v32, %v3155_v6 }
 0xaf3   :  { %v2497_v62 = vpop.eup %2496 }
 0xaf4   :  { %727 = vrot.lane.b32.xlu1 %v2497_v62, %s3457_s2 }
 0xb66   :  { %v728_v3 = vpop.permute.xlu1 %727 }
 0xb67   :  { %v3247_v4 = vmul.f32 %v2495_v44, %v728_v3 }
 0xb69   :  { %v747_v5 = vsel %vm746_vm4, %v745_v34, %v3247_v4 }
 0xb6a   :  { %764 = vrot.lane.b32.xlu0 %v747_v5, %s2860_s7 }
 0xb6e   :  { %924 = vrot.lane.b32.xlu0 %v841_v7, %s3457_s2 }
 0xbdc   :  { %v765_v8 = vpop.permute.xlu0 %764 }
 0xbdd   :  { %2261 = vmatmul.mubr.msk.f32.vlgmr.msra.gmra.mrb[4].mxu1 %vm234_vm1, %v765_v8 }
 0xbde   :  { %2404 = vmatpush3.bf16.msra.mxu1 %v3233_v57  ;;  %2282 = vmatprep.mubr.msk.f32.mxu1 %vm2857_vm0, %v2858_v2 }
 0xbdf   :  { %2405 = vmatprep.subr.bf16.mxu1 %v2856_v0 }
 0xbe0   :  { %v925_v23 = vpop.permute.xlu0 %924 }
 0xbe2   :  { %2407 = vmatpush3.bf16.msra.mxu1 %v2400_v61 }
 0xbe3   :  { %2414 = vmatprep.subr.bf16.mxu1 %v2856_v0 }
 0xcb0   :  { %v834_v12 = vpop.f32.mrb[4].mxu1 }
 0xcb1   :  { %v3261_v13 = vadd.f32 %v2103_v11, %v834_v12  ;;  %v2262_v14 = vpop.f32.mrb[5].mxu1 }
 0xcb3   :  { %v915_v15 = vadd.f32 %v911_v9, %v3261_v13 }
 0xcb5   :  { %2498 = vtanh.f32 %v915_v15  ;;  %v2106_v17 = vmul.f32 -1.442695, %v915_v15 }
 0xcb7   :  { %2500 = vpow2.f32 %v2106_v17 }
 0xcbf   :  { %v2499_v16 = vpop.eup %2498 }
 0xcc0   :  { %929 = vrot.lane.b32.xlu1 %v2499_v16, %s3457_s2 }
 0xcc1   :  { %v2501_v18 = vpop.eup %2500 }
 0xcc2   :  { %v919_v19 = vadd.f32 1.0, %v2501_v18 }
 0xcc4   :  { %2502 = vrcp.f32 %v919_v19 }
 0xcce   :  { %v2503_v20 = vpop.eup %2502 }
 0xccf   :  { %v927_v24 = vmul.f32 %v2503_v20, %v925_v23 }
 0xd32   :  { %v930_v21 = vpop.permute.xlu1 %929 }
 0xd33   :  { %v932_v22 = vmul.f32 %v2503_v20, %v930_v21 }
 0xd35   :  { %934 = vrot.lane.b32.xlu1 %v932_v22, %s3457_s2 }
 0xda7   :  { %v935_v25 = vpop.permute.xlu1 %934 }
 0xda8   :  { %v937_v26 = vadd.f32 %v935_v25, %v927_v24 }
 0xdaa   :  { %2504 = vtanh.f32 %v937_v26  ;;  %v1031_v43 = vrot.slane %v937_v26, 6 }
 0xdb4   :  { %v2505_v27 = vpop.eup %2504 }
 0xdb5   :  { %940 = vrot.lane.b32.xlu0 %v2505_v27, %s3457_s2 }
 0xe27   :  { %v941_v28 = vpop.permute.xlu0 %940 }
 0xe28   :  { %v943_v29 = vmul.f32 %v2503_v20, %v941_v28 }
 0xe2a   :  { %945 = vrot.lane.b32.xlu1 %v943_v29, %s2860_s7  ;;  %v1282_v54 = vrot.slane %v943_v29, %v3279_v51 }
 0xe2c   :  { %v1283_v60 = vcombine.high %v1282_v54, %v1282_v54  ;;  %v1290_v63 = vrot.slane %v1282_v54, %v3279_v51 }
 0xe2e   :  { %v1297_v7 = vrot.slane %v1283_v60, %v3279_v51 }
 0xe9c   :  { %v946_v30 = vpop.permute.xlu1 %945 }
 0xe9d   :  { %2283 = vmatmul.mubr.msk.f32.vlgmr.msra.gmra.mrb[6].mxu1 %vm234_vm1, %v946_v30 }
 0xe9e   :  { %2416 = vmatpush3.bf16.msra.mxu1 %v3233_v57  ;;  %2304 = vmatprep.mubr.msk.f32.mxu1 %vm2857_vm0, %v2858_v2  ;;  %v3284_v57 = vsub.s32 0, %v3155_v6 }
 0xe9f   :  { %2417 = vmatprep.subr.bf16.mxu1 %v2856_v0 }
 0xea2   :  { %2419 = vmatpush3.bf16.msra.mxu1 %v2400_v61 }
 0xea3   :  { %2307 = vmatprep.subr.mxu1 %v2858_v2 }
 0xf70   :  { %v1015_v31 = vpop.f32.mrb[6].mxu1 }
 0xf71   :  { %v1020_v33 = vrot.slane %v1015_v31, 6  ;;  %v2284_v34 = vpop.f32.mrb[7].mxu1 }
 0xf73   :  { %v1022_v35 = vadd.f32 %v1020_v33, %v3261_v13 }
 0xf75   :  { %2506 = vtanh.f32 %v1022_v35  ;;  %v2108_v37 = vmul.f32 -1.442695, %v1022_v35 }
 0xf77   :  { %2508 = vpow2.f32 %v2108_v37 }
 0xf7f   :  { %v2507_v36 = vpop.eup %2506 }
 0xf80   :  { %1035 = vrot.lane.b32.xlu0 %v2507_v36, %s3457_s2 }
 0xf81   :  { %v2509_v38 = vpop.eup %2508 }
 0xf82   :  { %v1026_v39 = vadd.f32 1.0, %v2509_v38 }
 0xf84   :  { %2510 = vrcp.f32 %v1026_v39 }
 0xf8e   :  { %v2511_v40 = vpop.eup %2510 }
 0xf8f   :  { %v1033_v44 = vmul.f32 %v2511_v40, %v1031_v43 }
 0xff2   :  { %v1036_v41 = vpop.permute.xlu0 %1035 }
 0xff3   :  { %v1038_v42 = vmul.f32 %v2511_v40, %v1036_v41 }
 0xff5   :  { %1040 = vrot.lane.b32.xlu1 %v1038_v42, %s3457_s2 }
0x1067   :  { %v1041_v45 = vpop.permute.xlu1 %1040 }
0x1068   :  { %v1043_v46 = vadd.f32 %v1041_v45, %v1033_v44 }
0x106a   :  { %2512 = vtanh.f32 %v1043_v46  ;;  %v1138_v23 = vrot.slane %v1043_v46, 6 }
0x1074   :  { %v2513_v47 = vpop.eup %2512 }
0x1075   :  { %1046 = vrot.lane.b32.xlu0 %v2513_v47, %s3457_s2 }
0x10e7   :  { %v1047_v52 = vpop.permute.xlu0 %1046 }
0x10e8   :  { %v1049_v53 = vmul.f32 %v2511_v40, %v1047_v52 }
0x10ea   :  { %v1051_v55 = vrot.slane %v1049_v53, 2  ;;  %v1306_v56 = vrot.slane %v1049_v53, %v3279_v51 }
0x10ec   :  { %v1307_v58 = vcombine.high %v1306_v56, %v1306_v56  ;;  %v1314_v59 = vrot.slane %v1306_v56, %v3279_v51  ;;  %1052 = vrot.lane.b32.xlu1 %v1051_v55, %s2860_s7 }
0x10ee   :  { %v1321_v61 = vrot.slane %v1307_v58, %v3279_v51  ;;  %v1322_v62 = vcombine.high %v1314_v59, %v1314_v59  ;;  %v1410_v59 = vld [vmem:[#allocation8] sm:$0xff] }
0x10f0   :  { %v1323_v3 = vcombine.high %v1321_v61, %v1321_v61  ;;  %v1375_v5 = vrot.slane %v1322_v62, %v3284_v57 }
0x10f2   :  { %v1379_v6 = vrot.slane %v1323_v3, %v3284_v57  ;;  %v1403_v8 = vsel %vm1402_vm5, %v1290_v63, %v1375_v5  ;;  %v2862_v3 = vmov 0  }
0x10f3   :  { %2464 = vset.pattern.permute.xlu1 %v2862_v3  ;;  %2465 = vset.pattern.permute.xlu0 %v2862_v3 }
0x10f4   :  { %v1404_v9 = vsel %vm1402_vm5, %v1297_v7, %v1379_v6 }
0x115e   :  { %v1053_v10 = vpop.permute.xlu1 %1052 }
0x115f   :  { %2294 = vmatmul.mubr.msk.f32.vlgmr.msra.gmra.mrb[8].mxu0 %vm234_vm1, %v1053_v10 }
0x1160   :  { %2319 = vmatprep.mubr.msk.f32.mxu0 %vm2857_vm0, %v2858_v2  ;;  %2318 = vmatpush3.msra.mxu0 %v1410_v59 }
0x1161   :  { %2420 = vmatprep.subr.bf16.mxu0 %v2856_v0 }
0x1232   :  { %v1122_v11 = vpop.f32.mrb[8].mxu0 }
0x1233   :  { %v1127_v12 = vrot.slane %v1122_v11, 4  ;;  %v2295_v14 = vpop.f32.mrb[9].mxu0 }
0x1235   :  { %v1129_v15 = vadd.f32 %v1127_v12, %v3261_v13 }
0x1237   :  { %2514 = vtanh.f32 %v1129_v15  ;;  %v2110_v17 = vmul.f32 -1.442695, %v1129_v15  ;;  %v1570_v15 = vld [vmem:[%s3427_s4] sm:$0x3]  ;;  %s2863_s4 = smov 96  }
0x1239   :  { %2516 = vpow2.f32 %v2110_v17  ;;  %v1411_v17 = vld [vmem:[#allocation8 + $0x8] sm:$0xff] }
0x1241   :  { %v2515_v16 = vpop.eup %2514 }
0x1242   :  { %1142 = vrot.lane.b32.xlu0 %v2515_v16, %s3457_s2 }
0x1243   :  { %v2517_v18 = vpop.eup %2516 }
0x1244   :  { %v1133_v19 = vadd.f32 1.0, %v2517_v18 }
0x1246   :  { %2518 = vrcp.f32 %v1133_v19 }
0x1250   :  { %v2519_v20 = vpop.eup %2518 }
0x1251   :  { %v1140_v24 = vmul.f32 %v2519_v20, %v1138_v23 }
0x12b4   :  { %v1143_v21 = vpop.permute.xlu0 %1142 }
0x12b5   :  { %v1145_v22 = vmul.f32 %v2519_v20, %v1143_v21 }
0x12b7   :  { %1147 = vrot.lane.b32.xlu1 %v1145_v22, %s3457_s2 }
0x1329   :  { %v1148_v25 = vpop.permute.xlu1 %1147 }
0x132a   :  { %v1150_v26 = vadd.f32 %v1148_v25, %v1140_v24 }
0x132c   :  { %2520 = vtanh.f32 %v1150_v26  ;;  %v1245_v54 = vrot.slane %v1150_v26, 6 }
0x1336   :  { %v2521_v27 = vpop.eup %2520 }
0x1337   :  { %1153 = vrot.lane.b32.xlu0 %v2521_v27, %s3457_s2 }
0x13a9   :  { %v1154_v28 = vpop.permute.xlu0 %1153 }
0x13aa   :  { %v1156_v29 = vmul.f32 %v2519_v20, %v1154_v28  ;;  %v1569_v20 = vand.u32 127, %v222_v1 }
0x13ac   :  { %v1158_v30 = vrot.slane %v1156_v29, 4  ;;  %v1324_v31 = vcombine.high %v1156_v29, %v1156_v29 }
0x13ae   :  { %v1331_v33 = vrot.slane %v1324_v31, %v3279_v51  ;;  %1159 = vrot.lane.b32.xlu1 %v1158_v30, %s2860_s7 }
0x13b0   :  { %v1332_v34 = vcombine.high %v1331_v33, %v1331_v33  ;;  %v1339_v35 = vrot.slane %v1331_v33, %v3279_v51 }
0x13b2   :  { %v1346_v36 = vrot.slane %v1332_v34, %v3279_v51  ;;  %v1385_v37 = vrot.slane %v1339_v35, %v3284_v57 }
0x13b4   :  { %v1405_v38 = vsel %vm742_vm2, %v1403_v8, %v1385_v37  ;;  %v1389_v39 = vrot.slane %v1346_v36, %v3284_v57 }
0x13b6   :  { %v1406_v40 = vsel %vm742_vm2, %v1404_v9, %v1389_v39 }
0x1420   :  { %v1160_v41 = vpop.permute.xlu1 %1159 }
0x1421   :  { %2305 = vmatmul.mubr.msk.f32.vlgmr.msra.gmra.mrb[8].mxu1 %vm234_vm1, %v1160_v41 }
0x1422   :  { %2309 = vmatprep.mubr.msk.f32.mxu1 %vm2857_vm0, %v2858_v2  ;;  %2308 = vmatpush3.xpose.msk.msra.mxu1 %vm234_vm1, %v1410_v59 }
0x1423   :  { %2312 = vmatprep.subr.mxu1 %v2858_v2 }
0x14f4   :  { %v1229_v42 = vpop.f32.mrb[8].mxu1 }
0x14f5   :  { %v1234_v43 = vrot.slane %v1229_v42, 2  ;;  %v2306_v44 = vpop.f32.mrb[9].mxu1 }
0x14f7   :  { %v1236_v45 = vadd.f32 %v1234_v43, %v3261_v13 }
0x14f9   :  { %2522 = vtanh.f32 %v1236_v45  ;;  %v2112_v47 = vmul.f32 -1.442695, %v1236_v45 }
0x14fb   :  { %2524 = vpow2.f32 %v2112_v47 }
0x1503   :  { %v2523_v46 = vpop.eup %2522 }
0x1504   :  { %1249 = vrot.lane.b32.xlu0 %v2523_v46, %s3457_s2 }
0x1505   :  { %v2525_v48 = vpop.eup %2524 }
0x1506   :  { %v1240_v49 = vadd.f32 1.0, %v2525_v48 }
0x1508   :  { %2526 = vrcp.f32 %v1240_v49 }
0x1512   :  { %v2527_v32 = vpop.eup %2526 }
0x1513   :  { %v1247_v55 = vmul.f32 %v2527_v32, %v1245_v54  ;;  %v1789_v54 = vld [vmem:[#allocation16 + $0x8] sm:$0xff] }
0x1576   :  { %v1250_v52 = vpop.permute.xlu0 %1249 }
0x1577   :  { %v1252_v53 = vmul.f32 %v2527_v32, %v1250_v52 }
0x1579   :  { %1254 = vrot.lane.b32.xlu1 %v1252_v53, %s3457_s2  ;;  %v1788_v53 = vld [vmem:[#allocation16] sm:$0xff] }
0x15eb   :  { %v1255_v56 = vpop.permute.xlu1 %1254 }
0x15ec   :  { %v3314_v58 = vadd.f32 %v1255_v56, %v1247_v55  ;;  %v2421_v56 = vpack.c.bf16 %v1789_v54, %v1788_v53 }
0x15ee   :  { %2528 = vtanh.f32 %v3314_v58 }
0x15f8   :  { %v2529_v13 = vpop.eup %2528 }
0x15f9   :  { %1260 = vrot.lane.b32.xlu0 %v2529_v13, %s3457_s2 }
0x166b   :  { %v1261_v60 = vpop.permute.xlu0 %1260 }
0x166c   :  { %v1263_v61 = vmul.f32 %v2527_v32, %v1261_v60  ;;  %v1790_v60 = vld [vmem:[#allocation16 + $0x10] sm:$0xff] }
0x166e   :  { %v1347_v62 = vcombine.high %v1263_v61, %v1263_v61 }
0x1670   :  { %v1354_v63 = vrot.slane %v1347_v62, %v3279_v51 }
0x1672   :  { %v1355_v5 = vcombine.high %v1354_v63, %v1354_v63  ;;  %v1362_v7 = vrot.slane %v1354_v63, %v3279_v51  ;;  %v1784_v63 = vld [vmem:[#allocation14] sm:$0xff] }
0x1674   :  { %v1369_v6 = vrot.slane %v1355_v5, %v3279_v51  ;;  %v1370_v8 = vcombine.high %v1362_v7, %v1362_v7  ;;  %v1786_v7 = vld [vmem:[#allocation14 + $0x10] sm:$0xff] }
0x1676   :  { %v1395_v9 = vrot.slane %v1370_v8, %v3284_v57  ;;  %v1371_v10 = vcombine.high %v1369_v6, %v1369_v6  ;;  %v1787_v6 = vld [vmem:[#allocation14 + $0x18] sm:$0xff] }
0x1677   :  { %v2430_v8 = vpack.c.bf16 %v1787_v6, %v1786_v7 }
0x1678   :  { %v1408_v11 = vsel %vm1407_vm6, %v1405_v38, %v1395_v9  ;;  %v1399_v12 = vrot.slane %v1371_v10, %v3284_v57 }
0x1679   :  { %1413 = vrot.lane.b32.xlu1 %v1408_v11, %s2860_s7 }
0x167a   :  { %v1409_v14 = vsel %vm1407_vm6, %v1406_v40, %v1399_v12 }
0x167b   :  { %1491 = vrot.lane.b32.xlu0 %v1409_v14, %s2860_s7  ;;  %v1792_v16 = vcombine.low %v1408_v11, %v1409_v14 }
0x167d   :  { %1572 = vperm.xlu1 %2464, %v1570_v15  }
0x16eb   :  { %v1414_v18 = vpop.permute.xlu1 %1413 }
0x16ec   :  { %2310 = vmatmul.mubr.msk.f32.vlgmr.msra.gmra.mrb[10].mxu1 %vm234_vm1, %v1414_v18  ;;  %v1953_v18 = vld [vmem:[#allocation17 + $0x10] sm:$0xff] }
0x16ed   :  { %2313 = vmatpush3.xpose.msk.msra.mxu1 %vm234_vm1, %v1411_v17  ;;  %2314 = vmatprep.mubr.msk.f32.mxu1 %vm2857_vm0, %v2858_v2  ;;  %v1492_v19 = vpop.permute.xlu0 %1491 }
0x16ee   :  { %2322 = vmatprep.subr.mxu1 %v2858_v2 }
0x16f0   :  { %2315 = vmatmul.mubr.msk.f32.vlgmr.msra.gmra.mrb[12].mxu1 %vm234_vm1, %v1492_v19 }
0x16f1   :  { %2323 = vmatpush3.msra.mxu1 %v1411_v17  ;;  %2324 = vmatprep.mubr.msk.f32.mxu1 %vm2857_vm0, %v2858_v2  ;;  %v1952_v17 = vld [vmem:[#allocation17 + $0x8] sm:$0xff] }
0x16f2   :  { %2426 = vmatprep.subr.bf16.mxu1 %v2856_v0 }
0x16fc   :  { %v1573_v21 = vpop.permute.xlu1 %1572 }
0x16fd   :  { %vm1574_vm7 = vcmp.lt.s32.totalorder %v1569_v20, %v1573_v21  ;;  %v1954_v20 = vld [vmem:[#allocation17 + $0x18] sm:$0xff] }
0x16fe   :  { %v1575_v22 = vsel %vm1574_vm7, 1, %v2862_v3  ;;  %v2436_v21 = vpack.c.bf16 %v1954_v20, %v1953_v18 }
0x16ff   :  { %v1582_v23 = vrot.slane %v1575_v22, %v3279_v51 }
0x1701   :  { %v1590_v24 = vrot.slane %v1582_v23, %v3279_v51  ;;  %v1583_v25 = vcombine.high %v1582_v23, %v1582_v23  ;;  %v2121_v23 = vld [vmem:[%s3436_s13] ss:$0 sm:$0xff] }
0x1703   :  { %vm1598_vm8 = vcmp.ne.s32.totalorder %v1590_v24, 0  ;;  %v1597_v26 = vrot.slane %v1583_v25, %v3279_v51 }
0x1704   :  { %v1600_v27 = vsel %vm1598_vm8, 1, %v2862_v3 }
0x1705   :  { %v1605_v28 = vrot.slane %v1600_v27, %v3284_v57  ;;  %vm1599_vm9 = vcmp.ne.s32.totalorder %v1597_v26, 0 }
0x1706   :  { %v1601_v29 = vsel %vm1599_vm9, 1, %v2862_v3  ;;  %v1785_v3 = vld [vmem:[#allocation14 + $0x8] sm:$0xff] }
0x1707   :  { %vm1610_vm10 = vcmp.eq.s32.totalorder %v1605_v28, 1  ;;  %v1609_v1 = vrot.slane %v1601_v29, %v3284_v57  ;;  %v2427_v5 = vpack.c.bf16 %v1785_v3, %v1784_v63 }
0x1709   :  { %vm1611_vm12 = vcmp.eq.s32.totalorder %v1609_v1, 1 }
0x17bf   :  { %v1486_v30 = vpop.f32.mrb[10].mxu1 }
0x17c0   :  { %v1612_v31 = vsel %vm1610_vm10, %v1486_v30, -1e+30  ;;  %v2311_v33 = vpop.f32.mrb[11].mxu1 }
0x17c1   :  { %v1615_v34 = vsel %vm1614_vm11, %v1612_v31, -inf }
0x17c2   :  { %1616 = vmax.xlane.f32.xlu0 %v1615_v34 }
0x17c3   :  { %v1564_v35 = vpop.f32.mrb[12].mxu1 }
0x17c4   :  { %v1613_v36 = vsel %vm1611_vm12, %v1564_v35, -1e+30  ;;  %v2316_v37 = vpop.f32.mrb[13].mxu1 }
0x17c5   :  { %v1618_v51 = vsel %vm1614_vm11, %v1613_v36, -inf }
0x17c6   :  { %1619 = vmax.xlane.f32.xlu1 %v1618_v51 }
0x17d7   :  { %1793 = vrot.lane.b32.xlu1 %v1792_v16, %s2860_s7 }
0x17db   :  { %1265 = vrot.lane.b32.xlu1 %v1263_v61, %s2860_s7  ;;  %v1791_v61 = vld [vmem:[#allocation16 + $0x18] sm:$0xff] }
0x17df   :  { %738 = vrot.lane.b32.xlu1 %v3218_v50, %s2863_s4 }
0x184f   :  { %v1617_v57 = vpop.xlane.xlu0 %1616 }
0x1850   :  { %v1621_v38 = vsub.f32 %v1612_v31, %v1617_v57 }
0x1852   :  { %v1623_v39 = vmul.f32 1.442695, %v1621_v38 }
0x1853   :  { %v1620_v40 = vpop.xlane.xlu1 %1619 }
0x1854   :  { %2530 = vpow2.f32 %v1623_v39  ;;  %v1622_v41 = vsub.f32 %v1613_v36, %v1620_v40 }
0x1856   :  { %v1625_v42 = vmul.f32 1.442695, %v1622_v41 }
0x1857   :  { %v1794_v43 = vpop.permute.xlu1 %1793 }
0x1858   :  { %2532 = vpow2.f32 %v1625_v42 }
0x185b   :  { %v1266_v44 = vpop.permute.xlu1 %1265 }
0x185c   :  { %1269 = vst.msk [vmem:[#allocation20 - $0x4] sm:$0xc0] %vm735_vm13, %v1266_v44 }
0x185e   :  { %v2531_v45 = vpop.eup %2530 }
0x185f   :  { %v739_v46 = vpop.permute.xlu1 %738  ;;  %v1627_v47 = vsel %vm1614_vm11, %v2531_v45, 0.0 }
0x1860   :  { %741 = vst.msk [vmem:[#allocation22 - $0x6] sm:$0xc0] %vm735_vm13, %v739_v46  ;;  %1628 = vadd.xlane.f32.xlu0 %v1627_v47 }
0x1862   :  { %v2533_v50 = vpop.eup %2532 }
0x1863   :  { %v1630_v48 = vsel %vm1614_vm11, %v2533_v50, 0.0 }
0x1864   :  { %1631 = vadd.xlane.f32.xlu0 %v1630_v48 }
0x187a   :  { %732 = vrot.lane.b32.xlu0 %v3247_v4, %s2860_s7 }
0x187e   :  { %1271 = vrot.lane.b32.xlu0 %v3314_v58, %s2863_s4  ;;  %v2424_v58 = vpack.c.bf16 %v1791_v61, %v1790_v60 }
0x18ed   :  { %v1629_v49 = vpop.xlane.xlu0 %1628 }
0x18ee   :  { %2534 = vrcp.f32 %v1629_v49 }
0x18f1   :  { %v1632_v32 = vpop.xlane.xlu0 %1631 }
0x18f2   :  { %2536 = vrcp.f32 %v1632_v32 }
0x18f5   :  { %v733_v52 = vpop.permute.xlu0 %732 }
0x18f6   :  { %736 = vst.msk [vmem:[#allocation20 - $0x6] sm:$0xc0] %vm735_vm13, %v733_v52 }
0x18f8   :  { %v2535_v55 = vpop.eup %2534 }
0x18f9   :  { %v1635_v13 = vmul.f32 %v2535_v55, %v2531_v45  ;;  %v1272_v59 = vpop.permute.xlu0 %1271 }
0x18fa   :  { %1275 = vst.msk [vmem:[#allocation22 - $0x4] sm:$0xc0] %vm735_vm13, %v1272_v59 }
0x18fb   :  { %2320 = vmatmul.mubr.msk.f32.vlgmr.msra.gmra.mrb[10].mxu0 %vm1637_vm14, %v1635_v13 }
0x18fc   :  { %v2537_v4 = vpop.eup %2536  ;;  %2422 = vmatpush3.bf16.msra.mxu0 %v2421_v56  ;;  %2335 = vmatprep.mubr.msk.f32.mxu0 %vm2857_vm0, %v2858_v2 }
0x18fd   :  { %v1636_v62 = vmul.f32 %v2537_v4, %v2533_v50  ;;  %2423 = vmatprep.subr.bf16.mxu0 %v2856_v0 }
0x18ff   :  { %2325 = vmatmul.mubr.msk.f32.vlgmr.msra.gmra.mrb[14].mxu1 %vm1637_vm14, %v1636_v62 }
0x1900   :  { %2425 = vmatpush3.bf16.msra.mxu0 %v2424_v58  ;;  %2346 = vmatprep.mubr.msk.f32.mxu1 %vm2857_vm0, %v2858_v2 }
0x1901   :  { %2432 = vmatprep.subr.bf16.mxu0 %v2856_v0  ;;  %2428 = vmatpush3.bf16.msra.mxu1 %v2427_v5 }
0x1902   :  { %2429 = vmatprep.subr.bf16.mxu1 %v2856_v0 }
0x1903   :  { %2336 = vmatmul.mubr.msk.f32.vlgmr.msra.gmra.mrb[12].mxu0 %vm234_vm1, %v1794_v43 }
0x1904   :  { %2357 = vmatprep.mubr.msk.f32.mxu0 %vm2857_vm0, %v2858_v2  ;;  %v1951_v2 = vld [vmem:[#allocation17] sm:$0xff] }
0x1905   :  { %2431 = vmatpush3.bf16.msra.mxu1 %v2430_v8  ;;  %v2433_v19 = vpack.c.bf16 %v1952_v17, %v1951_v2 }
0x1907   :  { %2434 = vmatpush3.bf16.msra.mxu0 %v2433_v19 }
0x1908   :  { %2435 = vmatprep.subr.bf16.mxu0 %v2856_v0 }
0x190b   :  { %2437 = vmatpush3.bf16.msra.mxu0 %v2436_v21 }
0x19ce   :  { %v1707_v9 = vpop.f32.mrb[10].mxu0 }
0x19cf   :  { %v2321_v10 = vpop.f32.mrb[11].mxu0 }
0x19d2   :  { %v1780_v11 = vpop.f32.mrb[14].mxu1 }
0x19d3   :  { %v1869_v12 = vcombine.low %v1707_v9, %v1780_v11  ;;  %v2326_v14 = vpop.f32.mrb[15].mxu1 }
0x19d5   :  { %2347 = vmatmul.mubr.msk.f32.vlgmr.msra.gmra.mrb[16].mxu1 %vm234_vm1, %v1869_v12 }
0x19d6   :  { %v1863_v15 = vpop.f32.mrb[12].mxu0 }
0x19d7   :  { %v2337_v16 = vpop.f32.mrb[13].mxu0 }
0x1aa8   :  { %v1938_v22 = vpop.f32.mrb[16].mxu1 }
0x1aa9   :  { %v1939_v24 = vadd.f32 %v1938_v22, %v1863_v15  ;;  %v2348_v25 = vpop.f32.mrb[17].mxu1 }
0x1aab   :  { %v1949_v26 = vadd.f32 %v2121_v23, %v1939_v24 }
0x1aad   :  { %2538 = vtanh.f32 %v1949_v26 }
0x1ab7   :  { %v2539_v27 = vpop.eup %2538 }
0x1ab8   :  { %2358 = vmatmul.mubr.msk.f32.vlgmr.msra.gmra.mrb[14].mxu0 %vm234_vm1, %v2539_v27 }
0x1ab9   :  { %2771 = shalt.err (!%p2768_p0)
}
0x1aba   :  { %s2772_s13 = scalar_lea.hbm %s3440_s17, 64 }
0x1abb   :  { %p2773_p1 = scmp.ne.s32.totalorder %s3440_s17, %s2772_s13  ;;  %p2776_p2 = scmp.lt.u32.totalorder %s2772_s13, %s3440_s17 }
0x1abd   :  { %p2778_p3 = pnand %p2776_p2, %p2773_p1 }
0x1abf   :  { %2781 = shalt.err (!%p2778_p3)
}
0x1ac0   :  { %2063 = dma.vmem_to_hbm [thread:$0]  %s2058_s30, 64, %s3440_s17, [#allocation21], %s3457_s2, %s3457_s2, %s3456_s21  }
0x1ac1   :  { %s2865_s19 = smov [#allocation22]  }
0x1ac2   :  { %s2069_s3 = sshll.u32 %s2865_s19, 4  ;;  %s2070_s3 = int_to_ptr.vmem [resolvable:$true] %s2069_s3 }
0x1ac3   :  { %s2782_s25 = scalar_lea.vmem %s2070_s3, 64  ;;  %p2787_p5 = scmp.lt.s32.totalorder %s2070_s3, %s2070_s3 }
0x1ac4   :  { %p2783_p4 = scmp.ne.s32.totalorder %s2070_s3, %s2782_s25  ;;  %p2788_p6 = scmp.lt.s32.totalorder %s2782_s25, %s2782_s25 }
0x1ac6   :  { %p2789_p7 = por %p2788_p6, %p2787_p5 }
0x1ac8   :  { %p2790_p8 = pnand %p2789_p7, %p2783_p4 }
0x1aca   :  { %2793 = shalt.err (!%p2790_p8)
}
0x1acb   :  { %s2794_s23 = scalar_lea.hbm %s3441_s18, 64 }
0x1acc   :  { %p2795_p9 = scmp.ne.s32.totalorder %s3441_s18, %s2794_s23  ;;  %p2798_p10 = scmp.lt.u32.totalorder %s2794_s23, %s3441_s18 }
0x1ace   :  { %p2800_p11 = pnand %p2798_p10, %p2795_p9 }
0x1ad0   :  { %2803 = shalt.err (!%p2800_p11)
}
0x1ad1   :  { %2075 = dma.vmem_to_hbm [thread:$0]  %s2070_s3, 64, %s3441_s18, [#allocation21], %s3457_s2, %s3457_s2, %s3456_s21  }
0x1ad2   :  { %v2122_v0 = vld [vmem:[%s3438_s15] ss:$0 sm:$0xff]  ;;  %s2866_s20 = smov [#allocation19]  }
0x1ad3   :  { %s2045_s30 = sshll.u32 %s2866_s20, 4  ;;  %s2046_s30 = int_to_ptr.vmem [resolvable:$true] %s2045_s30 }
0x1ad4   :  { %s2804_s24 = scalar_lea.vmem %s2046_s30, 128  ;;  %p2809_p13 = scmp.lt.s32.totalorder %s2046_s30, %s2046_s30 }
0x1ad5   :  { %p2805_p12 = scmp.ne.s32.totalorder %s2046_s30, %s2804_s24  ;;  %p2810_p0 = scmp.lt.s32.totalorder %s2804_s24, %s2804_s24 }
0x1ad7   :  { %p2811_p1 = por %p2810_p0, %p2809_p13 }
0x1ad9   :  { %p2812_p2 = pnand %p2811_p1, %p2805_p12 }
0x1b8b   :  { %v2031_v28 = vpop.f32.mrb[14].mxu0 }
0x1b8c   :  { %v2032_v29 = vadd.f32 %v2122_v0, %v2031_v28  ;;  %v2359_v30 = vpop.f32.mrb[15].mxu0 }
0x1b8e   :  { %v2036_v1 = vcombine.high %v2032_v29, %v2032_v29  ;;  %2038 = vst [vmem:[#allocation19] sm:$0xf] %v2032_v29 }
0x1b90   :  { %2039 = vst [vmem:[#allocation19 + $0x4] sm:$0xf] %v2036_v1 }
0x1b91   :  { %2815 = shalt.err (!%p2812_p2)
}
0x1b92   :  { %s3459_s2 = sld [smem:[#allocation34_spill]] }
0x1b98   :  { %s2816_s15 = scalar_lea.hbm %s3459_s2, 128 }
0x1b99   :  { %p2817_p3 = scmp.ne.s32.totalorder %s3459_s2, %s2816_s15  ;;  %p2820_p4 = scmp.lt.u32.totalorder %s2816_s15, %s3459_s2 }
0x1b9b   :  { %p2822_p5 = pnand %p2820_p4, %p2817_p3 }
0x1b9d   :  { %2825 = shalt.err (!%p2822_p5)
}
0x1b9e   :  { %s2867_s22 = smov 4  }
0x1b9f   :  { %2051 = dma.vmem_to_hbm [thread:$0]  %s2046_s30, 128, %s3459_s2, [#allocation4], %s2860_s7, %s2860_s7, %s2867_s22  }
0x1ba0   :  { %2838 = dma.done.wait [#allocation4], 128  }
0x1ba1   :  { %2839 = vsyncadd [#allocation4], 4294967168 }
0x1ba2   :  { %2840 = dma.done.wait [#allocation21], 128  }
0x1ba3   :  { %2841 = vsyncadd [#allocation21], 4294967168 }
0x1ba4   :  { %2085 = vsyncpa [#allocation3], 1 }
0x1ba5   :  { %2086 = vsyncpa [#allocation6], 1 }
0x1ba6   :  { %2087 = vsyncpa [#allocation9], 1 }
0x1ba7   :  { %2088 = vsyncpa [#allocation12], 1 }
0x1ba8   :  { %2089 = vsyncpa [#allocation15], 1 }
0x1ba9   :  { %2090 = vsyncpa [#allocation18], 1 }
0x1baa   :  { %2091 = vsyncpa [#allocation4], 1 }
0x1bab   :  { %2092 = vsyncpa [#allocation21], 1 }

</bundles_post_ra>
